<compile_context>
chip_gen: v7x
topology: tpu7x:2x2x1
jax: 0.10.0
libtpu: 0.0.40
codegen_flags: <defaults>
</compile_context>

<pallas_src>
import functools

import jax
import jax.numpy as jnp
from jax.experimental import pallas as pl
from jax.experimental.pallas import tpu as pltpu

EPS = 1e-5  # nn.BatchNorm2d default eps


def conv_bn_relu_kernel(xcol_ref, w_ref, gamma_ref, beta_ref, o_ref, acc_ref,
                        *, inv_m, chunk):
    # xcol_ref:  (MP, KP)  bf16  im2col input rows (zero-padded rows/lanes)
    # w_ref:     (KP, OP)  bf16  im2col weight (zero-padded)
    # gamma_ref: (1, OP)   f32   BN weight (zero-padded)
    # beta_ref:  (1, OP)   f32   BN bias   (zero-padded)
    # o_ref:     (MP, OP)  f32   lane-dense output (padding sliced off outside)
    # acc_ref:   (MP, OP)  f32   VMEM scratch holding the conv result
    MP, _ = xcol_ref.shape
    OP = w_ref.shape[-1]
    n_chunks = MP // chunk

    # Hoist the (small) weight load out of the chunk loop.
    w = w_ref[...]

    # Pass 1: conv chunk -> VMEM scratch, plus running per-channel sum / sum-sq.
    def conv_stats_body(i, carry):
        s1, s2 = carry
        r = pl.multiple_of(i * chunk, chunk)
        a = jnp.dot(xcol_ref[pl.ds(r, chunk), :], w,
                    preferred_element_type=jnp.float32)          # (chunk, OP) f32
        acc_ref[pl.ds(r, chunk), :] = a
        s1 = s1 + jnp.sum(a, axis=0, keepdims=True)
        s2 = s2 + jnp.sum(a * a, axis=0, keepdims=True)
        return s1, s2

    s1, s2 = jax.lax.fori_loop(
        0, n_chunks, conv_stats_body,
        (jnp.zeros((1, OP), jnp.float32), jnp.zeros((1, OP), jnp.float32)),
        unroll=True)

    # Padded rows/channels contribute exactly zero to s1/s2, so inv_m uses the
    # true element count and the statistics are exact.
    mean = s1 * inv_m
    var = jnp.maximum(s2 * inv_m - mean * mean, 0.0)  # guard tiny negatives
    scale = gamma_ref[...] * jax.lax.rsqrt(var + EPS)            # rsqrt -> EUP
    shift = beta_ref[...] - mean * scale

    # Hoist the sublane broadcast out of the apply loop (JAX does not CSE it).
    scale_b = jnp.broadcast_to(scale, (chunk, OP))
    shift_b = jnp.broadcast_to(shift, (chunk, OP))

    # Pass 2: fused per-channel FMA + ReLU, streamed from the VMEM scratch.
    def apply_body(i, _):
        r = pl.multiple_of(i * chunk, chunk)
        a = acc_ref[pl.ds(r, chunk), :]
        o_ref[pl.ds(r, chunk), :] = jnp.maximum(
            a * scale_b + shift_b, 0.0).astype(o_ref.dtype)
        return 0

    jax.lax.fori_loop(0, n_chunks, apply_body, 0, unroll=True)


def conv_batch_norm(x_nchw, weight_ochw, bias, gamma, beta, *, chunk=64):
    """x_nchw: (N, C, H, W); weight: (O, C, 3, 3); bias/gamma/beta: (O,).

    Conv2d(3x3, pad=1) -> BatchNorm2d (training-mode batch stats) -> ReLU.
    `bias` is accepted for parity with the PyTorch module but is a mathematical
    no-op under training-mode BN, so it is not passed to the kernel.
    """
    del bias  # exactly cancelled by the batch-mean subtraction
    N, C, H, W = x_nchw.shape
    O = weight_ochw.shape[0]
    K = 9 * C
    OP = ((O + 127) // 128) * 128          # lane-dense out channels
    KP = ((K + 127) // 128) * 128          # lane-dense contraction depth
    M = N * H * W
    MP = ((M + chunk - 1) // chunk) * chunk

    # im2col in the wrapper: the input is tiny, so the 9x duplication is free
    # and hands the kernel a single lane-dense (M, 9C) operand.
    x_nhwc = jnp.transpose(x_nchw, (0, 2, 3, 1))
    x_pad = jnp.pad(x_nhwc, ((0, 0), (1, 1), (1, 1), (0, 0)))
    cols = [x_pad[:, dy:dy + H, dx:dx + W, :]
            for dy in range(3) for dx in range(3)]                # tap-major
    xcol = jnp.concatenate(cols, axis=-1).reshape(M, K)
    xcol = jnp.pad(xcol, ((0, MP - M), (0, KP - K))).astype(jnp.bfloat16)

    # (O, C, kh, kw) -> (kh, kw, C, O) -> (9C, O); same tap-major order as xcol.
    w = jnp.transpose(weight_ochw, (2, 3, 1, 0)).reshape(K, O)
    w = jnp.pad(w, ((0, KP - K), (0, OP - O))).astype(jnp.bfloat16)

    g2 = jnp.pad(gamma, (0, OP - O)).reshape(1, OP).astype(jnp.float32)
    b2 = jnp.pad(beta, (0, OP - O)).reshape(1, OP).astype(jnp.float32)

    kernel = functools.partial(conv_bn_relu_kernel, inv_m=1.0 / M, chunk=chunk)
    vmem = pl.BlockSpec(memory_space=pltpu.MemorySpace.VMEM)
    out = pl.pallas_call(
        kernel,
        out_shape=jax.ShapeDtypeStruct((MP, OP), jnp.float32),
        in_specs=[vmem, vmem, vmem, vmem],
        out_specs=vmem,
        scratch_shapes=[pltpu.VMEM((MP, OP), jnp.float32)],
    )(xcol, w, g2, b2)

    # Drop padding, restore (N, C, H, W) to match the PyTorch output convention.
    out = out[:M, :O].reshape(N, H, W, O)
    return jnp.transpose(out, (0, 3, 1, 2))


def _reference(x_nchw, weight, bias, gamma, beta):
    """Pure-JAX reference (conv WITH bias + training-mode BN + ReLU)."""
    y = jax.lax.conv_general_dilated(
        x_nchw, weight, window_strides=(1, 1), padding=((1, 1), (1, 1)),
        dimension_numbers=('NCHW', 'OIHW', 'NCHW'),
        precision=jax.lax.Precision.HIGHEST)
    y = y + bias.reshape(1, -1, 1, 1)
    mean = jnp.mean(y, axis=(0, 2, 3), keepdims=True)
    var = jnp.mean((y - mean) ** 2, axis=(0, 2, 3), keepdims=True)
    y = (y - mean) / jnp.sqrt(var + EPS)
    y = y * gamma.reshape(1, -1, 1, 1) + beta.reshape(1, -1, 1, 1)
    return jnp.maximum(y, 0.0)


if __name__ == "__main__":
    # Small shapes consistent with the module: batch=2, in_channels=4,
    # out_channels=8, spatial 16x16.
    N, C_in, C_out, H, W = 2, 4, 8, 16, 16

    key = jax.random.PRNGKey(0)
    kx, kw, kb, kg, kbe = jax.random.split(key, 5)

    x = jax.random.normal(kx, (N, C_in, H, W), dtype=jnp.float32)
    # Deterministic synthetic parameters (not a checkpoint load).
    weight = jax.random.normal(kw, (C_out, C_in, 3, 3), dtype=jnp.float32) * 0.1
    bias = jax.random.normal(kb, (C_out,), dtype=jnp.float32) * 0.1
    gamma = 1.0 + 0.1 * jax.random.normal(kg, (C_out,), dtype=jnp.float32)
    beta = 0.1 * jax.random.normal(kbe, (C_out,), dtype=jnp.float32)

    out = conv_batch_norm(x, weight, bias, gamma, beta)
    out = jax.block_until_ready(out)
    assert out.shape == (N, C_out, H, W)

    # Strict check against a reference whose conv operands are quantized to the
    # same bf16 the kernel feeds the MXU (bf16*bf16 products are exact in f32,
    # so only accumulation order differs -> ~1e-6 level).
    x_q = x.astype(jnp.bfloat16).astype(jnp.float32)
    w_q = weight.astype(jnp.bfloat16).astype(jnp.float32)
    ref_q = _reference(x_q, w_q, bias, gamma, beta)
    assert jnp.allclose(out, ref_q, atol=1e-4, rtol=1e-4), \
        "mismatch vs bf16-operand JAX reference"

    # Sanity check against full-f32 module semantics; the gap is bounded by the
    # bf16 operand quantization of the conv inputs.
    ref = _reference(x, weight, bias, gamma, beta)
    assert jnp.allclose(out, ref, atol=5e-2, rtol=5e-2), \
        "mismatch vs f32 JAX reference beyond bf16 quantization budget"

    print("KERNEL_OK")
</pallas_src>

<mosaic_0001>
module attributes {stable_mosaic.version = 11 : i64} {
  func.func @conv_bn_relu_kernel(%arg0: memref<512x128xbf16, #tpu.memory_space<vmem>>, %arg1: memref<128x128xbf16, #tpu.memory_space<vmem>>, %arg2: memref<1x128xf32, #tpu.memory_space<vmem>>, %arg3: memref<1x128xf32, #tpu.memory_space<vmem>>, %arg4: memref<512x128xf32, #tpu.memory_space<vmem>>, %arg5: memref<512x128xf32, #tpu.memory_space<vmem>>) attributes {dimension_semantics = [], scalar_prefetch = 0 : i64, scratch_operands = 1 : i64, tpu.core_type = #tpu.core_type<tc>} {
    %c0 = arith.constant 0 : index
    %c0_0 = arith.constant 0 : index
    %0 = vector.load %arg1[%c0, %c0_0] : memref<128x128xbf16, #tpu.memory_space<vmem>>, vector<128x128xbf16>
    %cst = arith.constant 0.000000e+00 : f32
    %1 = vector.broadcast %cst : f32 to vector<1x128xf32>
    %cst_1 = arith.constant 0.000000e+00 : f32
    %2 = vector.broadcast %cst_1 : f32 to vector<1x128xf32>
    %c0_i32 = arith.constant 0 : i32
    %c64_i32 = arith.constant 64 : i32
    %3 = arith.muli %c0_i32, %c64_i32 : i32
    %4 = tpu.assume_multiple %3, 64 : i32
    %5 = arith.index_cast %4 : i32 to index
    %c0_2 = arith.constant 0 : index
    %6 = vector.load %arg0[%5, %c0_2] : memref<512x128xbf16, #tpu.memory_space<vmem>>, vector<64x128xbf16>
    %cst_3 = arith.constant dense<0.000000e+00> : vector<64x128xf32>
    %7 = tpu.matmul %6, %0, %cst_3 {dimension_numbers = #tpu.dot_dimension_numbers<[1], [0], [0], [1], [0, 0, 1, 1], [], []>} : vector<64x128xbf16>, vector<128x128xbf16>, vector<64x128xf32> -> vector<64x128xf32>
    %8 = arith.index_cast %4 : i32 to index
    %c0_4 = arith.constant 0 : index
    %9 = vector.load %arg5[%8, %c0_4] : memref<512x128xf32, #tpu.memory_space<vmem>>, vector<64x128xf32>
    tpu.vector_store %arg5[%8, %c0_4], %7 {strides = array<i32>} : memref<512x128xf32, #tpu.memory_space<vmem>>, vector<64x128xf32>,
    %cst_5 = arith.constant dense<0.000000e+00> : vector<128xf32>
    %10 = vector.multi_reduction <add>, %7, %cst_5 [0] : vector<64x128xf32> to vector<128xf32>
    %11 = vector.shape_cast %10 : vector<128xf32> to vector<1x128xf32>
    %12 = arith.addf %1, %11 : vector<1x128xf32>
    %13 = arith.mulf %7, %7 : vector<64x128xf32>
    %cst_6 = arith.constant dense<0.000000e+00> : vector<128xf32>
    %14 = vector.multi_reduction <add>, %13, %cst_6 [0] : vector<64x128xf32> to vector<128xf32>
    %15 = vector.shape_cast %14 : vector<128xf32> to vector<1x128xf32>
    %16 = arith.addf %2, %15 : vector<1x128xf32>
    %c1_i32 = arith.constant 1 : i32
    %c64_i32_7 = arith.constant 64 : i32
    %17 = arith.muli %c1_i32, %c64_i32_7 : i32
    %18 = tpu.assume_multiple %17, 64 : i32
    %19 = arith.index_cast %18 : i32 to index
    %c0_8 = arith.constant 0 : index
    %20 = vector.load %arg0[%19, %c0_8] : memref<512x128xbf16, #tpu.memory_space<vmem>>, vector<64x128xbf16>
    %cst_9 = arith.constant dense<0.000000e+00> : vector<64x128xf32>
    %21 = tpu.matmul %20, %0, %cst_9 {dimension_numbers = #tpu.dot_dimension_numbers<[1], [0], [0], [1], [0, 0, 1, 1], [], []>} : vector<64x128xbf16>, vector<128x128xbf16>, vector<64x128xf32> -> vector<64x128xf32>
    %22 = arith.index_cast %18 : i32 to index
    %c0_10 = arith.constant 0 : index
    %23 = vector.load %arg5[%22, %c0_10] : memref<512x128xf32, #tpu.memory_space<vmem>>, vector<64x128xf32>
    tpu.vector_store %arg5[%22, %c0_10], %21 {strides = array<i32>} : memref<512x128xf32, #tpu.memory_space<vmem>>, vector<64x128xf32>,
    %cst_11 = arith.constant dense<0.000000e+00> : vector<128xf32>
    %24 = vector.multi_reduction <add>, %21, %cst_11 [0] : vector<64x128xf32> to vector<128xf32>
    %25 = vector.shape_cast %24 : vector<128xf32> to vector<1x128xf32>
    %26 = arith.addf %12, %25 : vector<1x128xf32>
    %27 = arith.mulf %21, %21 : vector<64x128xf32>
    %cst_12 = arith.constant dense<0.000000e+00> : vector<128xf32>
    %28 = vector.multi_reduction <add>, %27, %cst_12 [0] : vector<64x128xf32> to vector<128xf32>
    %29 = vector.shape_cast %28 : vector<128xf32> to vector<1x128xf32>
    %30 = arith.addf %16, %29 : vector<1x128xf32>
    %c2_i32 = arith.constant 2 : i32
    %c64_i32_13 = arith.constant 64 : i32
    %31 = arith.muli %c2_i32, %c64_i32_13 : i32
    %32 = tpu.assume_multiple %31, 64 : i32
    %33 = arith.index_cast %32 : i32 to index
    %c0_14 = arith.constant 0 : index
    %34 = vector.load %arg0[%33, %c0_14] : memref<512x128xbf16, #tpu.memory_space<vmem>>, vector<64x128xbf16>
    %cst_15 = arith.constant dense<0.000000e+00> : vector<64x128xf32>
    %35 = tpu.matmul %34, %0, %cst_15 {dimension_numbers = #tpu.dot_dimension_numbers<[1], [0], [0], [1], [0, 0, 1, 1], [], []>} : vector<64x128xbf16>, vector<128x128xbf16>, vector<64x128xf32> -> vector<64x128xf32>
    %36 = arith.index_cast %32 : i32 to index
    %c0_16 = arith.constant 0 : index
    %37 = vector.load %arg5[%36, %c0_16] : memref<512x128xf32, #tpu.memory_space<vmem>>, vector<64x128xf32>
    tpu.vector_store %arg5[%36, %c0_16], %35 {strides = array<i32>} : memref<512x128xf32, #tpu.memory_space<vmem>>, vector<64x128xf32>,
    %cst_17 = arith.constant dense<0.000000e+00> : vector<128xf32>
    %38 = vector.multi_reduction <add>, %35, %cst_17 [0] : vector<64x128xf32> to vector<128xf32>
    %39 = vector.shape_cast %38 : vector<128xf32> to vector<1x128xf32>
    %40 = arith.addf %26, %39 : vector<1x128xf32>
    %41 = arith.mulf %35, %35 : vector<64x128xf32>
    %cst_18 = arith.constant dense<0.000000e+00> : vector<128xf32>
    %42 = vector.multi_reduction <add>, %41, %cst_18 [0] : vector<64x128xf32> to vector<128xf32>
    %43 = vector.shape_cast %42 : vector<128xf32> to vector<1x128xf32>
    %44 = arith.addf %30, %43 : vector<1x128xf32>
    %c3_i32 = arith.constant 3 : i32
    %c64_i32_19 = arith.constant 64 : i32
    %45 = arith.muli %c3_i32, %c64_i32_19 : i32
    %46 = tpu.assume_multiple %45, 64 : i32
    %47 = arith.index_cast %46 : i32 to index
    %c0_20 = arith.constant 0 : index
    %48 = vector.load %arg0[%47, %c0_20] : memref<512x128xbf16, #tpu.memory_space<vmem>>, vector<64x128xbf16>
    %cst_21 = arith.constant dense<0.000000e+00> : vector<64x128xf32>
    %49 = tpu.matmul %48, %0, %cst_21 {dimension_numbers = #tpu.dot_dimension_numbers<[1], [0], [0], [1], [0, 0, 1, 1], [], []>} : vector<64x128xbf16>, vector<128x128xbf16>, vector<64x128xf32> -> vector<64x128xf32>
    %50 = arith.index_cast %46 : i32 to index
    %c0_22 = arith.constant 0 : index
    %51 = vector.load %arg5[%50, %c0_22] : memref<512x128xf32, #tpu.memory_space<vmem>>, vector<64x128xf32>
    tpu.vector_store %arg5[%50, %c0_22], %49 {strides = array<i32>} : memref<512x128xf32, #tpu.memory_space<vmem>>, vector<64x128xf32>,
    %cst_23 = arith.constant dense<0.000000e+00> : vector<128xf32>
    %52 = vector.multi_reduction <add>, %49, %cst_23 [0] : vector<64x128xf32> to vector<128xf32>
    %53 = vector.shape_cast %52 : vector<128xf32> to vector<1x128xf32>
    %54 = arith.addf %40, %53 : vector<1x128xf32>
    %55 = arith.mulf %49, %49 : vector<64x128xf32>
    %cst_24 = arith.constant dense<0.000000e+00> : vector<128xf32>
    %56 = vector.multi_reduction <add>, %55, %cst_24 [0] : vector<64x128xf32> to vector<128xf32>
    %57 = vector.shape_cast %56 : vector<128xf32> to vector<1x128xf32>
    %58 = arith.addf %44, %57 : vector<1x128xf32>
    %c4_i32 = arith.constant 4 : i32
    %c64_i32_25 = arith.constant 64 : i32
    %59 = arith.muli %c4_i32, %c64_i32_25 : i32
    %60 = tpu.assume_multiple %59, 64 : i32
    %61 = arith.index_cast %60 : i32 to index
    %c0_26 = arith.constant 0 : index
    %62 = vector.load %arg0[%61, %c0_26] : memref<512x128xbf16, #tpu.memory_space<vmem>>, vector<64x128xbf16>
    %cst_27 = arith.constant dense<0.000000e+00> : vector<64x128xf32>
    %63 = tpu.matmul %62, %0, %cst_27 {dimension_numbers = #tpu.dot_dimension_numbers<[1], [0], [0], [1], [0, 0, 1, 1], [], []>} : vector<64x128xbf16>, vector<128x128xbf16>, vector<64x128xf32> -> vector<64x128xf32>
    %64 = arith.index_cast %60 : i32 to index
    %c0_28 = arith.constant 0 : index
    %65 = vector.load %arg5[%64, %c0_28] : memref<512x128xf32, #tpu.memory_space<vmem>>, vector<64x128xf32>
    tpu.vector_store %arg5[%64, %c0_28], %63 {strides = array<i32>} : memref<512x128xf32, #tpu.memory_space<vmem>>, vector<64x128xf32>,
    %cst_29 = arith.constant dense<0.000000e+00> : vector<128xf32>
    %66 = vector.multi_reduction <add>, %63, %cst_29 [0] : vector<64x128xf32> to vector<128xf32>
    %67 = vector.shape_cast %66 : vector<128xf32> to vector<1x128xf32>
    %68 = arith.addf %54, %67 : vector<1x128xf32>
    %69 = arith.mulf %63, %63 : vector<64x128xf32>
    %cst_30 = arith.constant dense<0.000000e+00> : vector<128xf32>
    %70 = vector.multi_reduction <add>, %69, %cst_30 [0] : vector<64x128xf32> to vector<128xf32>
    %71 = vector.shape_cast %70 : vector<128xf32> to vector<1x128xf32>
    %72 = arith.addf %58, %71 : vector<1x128xf32>
    %c5_i32 = arith.constant 5 : i32
    %c64_i32_31 = arith.constant 64 : i32
    %73 = arith.muli %c5_i32, %c64_i32_31 : i32
    %74 = tpu.assume_multiple %73, 64 : i32
    %75 = arith.index_cast %74 : i32 to index
    %c0_32 = arith.constant 0 : index
    %76 = vector.load %arg0[%75, %c0_32] : memref<512x128xbf16, #tpu.memory_space<vmem>>, vector<64x128xbf16>
    %cst_33 = arith.constant dense<0.000000e+00> : vector<64x128xf32>
    %77 = tpu.matmul %76, %0, %cst_33 {dimension_numbers = #tpu.dot_dimension_numbers<[1], [0], [0], [1], [0, 0, 1, 1], [], []>} : vector<64x128xbf16>, vector<128x128xbf16>, vector<64x128xf32> -> vector<64x128xf32>
    %78 = arith.index_cast %74 : i32 to index
    %c0_34 = arith.constant 0 : index
    %79 = vector.load %arg5[%78, %c0_34] : memref<512x128xf32, #tpu.memory_space<vmem>>, vector<64x128xf32>
    tpu.vector_store %arg5[%78, %c0_34], %77 {strides = array<i32>} : memref<512x128xf32, #tpu.memory_space<vmem>>, vector<64x128xf32>,
    %cst_35 = arith.constant dense<0.000000e+00> : vector<128xf32>
    %80 = vector.multi_reduction <add>, %77, %cst_35 [0] : vector<64x128xf32> to vector<128xf32>
    %81 = vector.shape_cast %80 : vector<128xf32> to vector<1x128xf32>
    %82 = arith.addf %68, %81 : vector<1x128xf32>
    %83 = arith.mulf %77, %77 : vector<64x128xf32>
    %cst_36 = arith.constant dense<0.000000e+00> : vector<128xf32>
    %84 = vector.multi_reduction <add>, %83, %cst_36 [0] : vector<64x128xf32> to vector<128xf32>
    %85 = vector.shape_cast %84 : vector<128xf32> to vector<1x128xf32>
    %86 = arith.addf %72, %85 : vector<1x128xf32>
    %c6_i32 = arith.constant 6 : i32
    %c64_i32_37 = arith.constant 64 : i32
    %87 = arith.muli %c6_i32, %c64_i32_37 : i32
    %88 = tpu.assume_multiple %87, 64 : i32
    %89 = arith.index_cast %88 : i32 to index
    %c0_38 = arith.constant 0 : index
    %90 = vector.load %arg0[%89, %c0_38] : memref<512x128xbf16, #tpu.memory_space<vmem>>, vector<64x128xbf16>
    %cst_39 = arith.constant dense<0.000000e+00> : vector<64x128xf32>
    %91 = tpu.matmul %90, %0, %cst_39 {dimension_numbers = #tpu.dot_dimension_numbers<[1], [0], [0], [1], [0, 0, 1, 1], [], []>} : vector<64x128xbf16>, vector<128x128xbf16>, vector<64x128xf32> -> vector<64x128xf32>
    %92 = arith.index_cast %88 : i32 to index
    %c0_40 = arith.constant 0 : index
    %93 = vector.load %arg5[%92, %c0_40] : memref<512x128xf32, #tpu.memory_space<vmem>>, vector<64x128xf32>
    tpu.vector_store %arg5[%92, %c0_40], %91 {strides = array<i32>} : memref<512x128xf32, #tpu.memory_space<vmem>>, vector<64x128xf32>,
    %cst_41 = arith.constant dense<0.000000e+00> : vector<128xf32>
    %94 = vector.multi_reduction <add>, %91, %cst_41 [0] : vector<64x128xf32> to vector<128xf32>
    %95 = vector.shape_cast %94 : vector<128xf32> to vector<1x128xf32>
    %96 = arith.addf %82, %95 : vector<1x128xf32>
    %97 = arith.mulf %91, %91 : vector<64x128xf32>
    %cst_42 = arith.constant dense<0.000000e+00> : vector<128xf32>
    %98 = vector.multi_reduction <add>, %97, %cst_42 [0] : vector<64x128xf32> to vector<128xf32>
    %99 = vector.shape_cast %98 : vector<128xf32> to vector<1x128xf32>
    %100 = arith.addf %86, %99 : vector<1x128xf32>
    %c7_i32 = arith.constant 7 : i32
    %c64_i32_43 = arith.constant 64 : i32
    %101 = arith.muli %c7_i32, %c64_i32_43 : i32
    %102 = tpu.assume_multiple %101, 64 : i32
    %103 = arith.index_cast %102 : i32 to index
    %c0_44 = arith.constant 0 : index
    %104 = vector.load %arg0[%103, %c0_44] : memref<512x128xbf16, #tpu.memory_space<vmem>>, vector<64x128xbf16>
    %cst_45 = arith.constant dense<0.000000e+00> : vector<64x128xf32>
    %105 = tpu.matmul %104, %0, %cst_45 {dimension_numbers = #tpu.dot_dimension_numbers<[1], [0], [0], [1], [0, 0, 1, 1], [], []>} : vector<64x128xbf16>, vector<128x128xbf16>, vector<64x128xf32> -> vector<64x128xf32>
    %106 = arith.index_cast %102 : i32 to index
    %c0_46 = arith.constant 0 : index
    %107 = vector.load %arg5[%106, %c0_46] : memref<512x128xf32, #tpu.memory_space<vmem>>, vector<64x128xf32>
    tpu.vector_store %arg5[%106, %c0_46], %105 {strides = array<i32>} : memref<512x128xf32, #tpu.memory_space<vmem>>, vector<64x128xf32>,
    %cst_47 = arith.constant dense<0.000000e+00> : vector<128xf32>
    %108 = vector.multi_reduction <add>, %105, %cst_47 [0] : vector<64x128xf32> to vector<128xf32>
    %109 = vector.shape_cast %108 : vector<128xf32> to vector<1x128xf32>
    %110 = arith.addf %96, %109 : vector<1x128xf32>
    %111 = arith.mulf %105, %105 : vector<64x128xf32>
    %cst_48 = arith.constant dense<0.000000e+00> : vector<128xf32>
    %112 = vector.multi_reduction <add>, %111, %cst_48 [0] : vector<64x128xf32> to vector<128xf32>
    %113 = vector.shape_cast %112 : vector<128xf32> to vector<1x128xf32>
    %114 = arith.addf %100, %113 : vector<1x128xf32>
    %c8_i32 = arith.constant 8 : i32
    %cst_49 = arith.constant 0.001953125 : f32
    %115 = vector.broadcast %cst_49 : f32 to vector<1x128xf32>
    %116 = arith.mulf %110, %115 : vector<1x128xf32>
    %cst_50 = arith.constant 0.001953125 : f32
    %117 = vector.broadcast %cst_50 : f32 to vector<1x128xf32>
    %118 = arith.mulf %114, %117 : vector<1x128xf32>
    %119 = arith.mulf %116, %116 : vector<1x128xf32>
    %120 = arith.subf %118, %119 : vector<1x128xf32>
    %cst_51 = arith.constant 0.000000e+00 : f32
    %121 = vector.broadcast %cst_51 : f32 to vector<1x128xf32>
    %122 = arith.maximumf %120, %121 : vector<1x128xf32>
    %c0_52 = arith.constant 0 : index
    %c0_53 = arith.constant 0 : index
    %123 = vector.load %arg2[%c0_52, %c0_53] : memref<1x128xf32, #tpu.memory_space<vmem>>, vector<1x128xf32>
    %cst_54 = arith.constant 9.99999974E-6 : f32
    %124 = vector.broadcast %cst_54 : f32 to vector<1x128xf32>
    %125 = arith.addf %122, %124 : vector<1x128xf32>
    %126 = math.rsqrt %125 : vector<1x128xf32>
    %127 = arith.mulf %123, %126 : vector<1x128xf32>
    %c0_55 = arith.constant 0 : index
    %c0_56 = arith.constant 0 : index
    %128 = vector.load %arg3[%c0_55, %c0_56] : memref<1x128xf32, #tpu.memory_space<vmem>>, vector<1x128xf32>
    %129 = arith.mulf %116, %127 : vector<1x128xf32>
    %130 = arith.subf %128, %129 : vector<1x128xf32>
    %131 = vector.shape_cast %127 : vector<1x128xf32> to vector<1x128xf32>
    %132 = vector.broadcast %131 : vector<1x128xf32> to vector<64x128xf32>
    %133 = vector.shape_cast %130 : vector<1x128xf32> to vector<1x128xf32>
    %134 = vector.broadcast %133 : vector<1x128xf32> to vector<64x128xf32>
    %c0_i32_57 = arith.constant 0 : i32
    %c64_i32_58 = arith.constant 64 : i32
    %135 = arith.muli %c0_i32_57, %c64_i32_58 : i32
    %136 = tpu.assume_multiple %135, 64 : i32
    %137 = arith.index_cast %136 : i32 to index
    %c0_59 = arith.constant 0 : index
    %138 = vector.load %arg5[%137, %c0_59] : memref<512x128xf32, #tpu.memory_space<vmem>>, vector<64x128xf32>
    %139 = arith.mulf %138, %132 : vector<64x128xf32>
    %140 = arith.addf %139, %134 : vector<64x128xf32>
    %cst_60 = arith.constant 0.000000e+00 : f32
    %141 = vector.broadcast %cst_60 : f32 to vector<64x128xf32>
    %142 = arith.maximumf %140, %141 : vector<64x128xf32>
    %143 = arith.index_cast %136 : i32 to index
    %c0_61 = arith.constant 0 : index
    %144 = vector.load %arg4[%143, %c0_61] : memref<512x128xf32, #tpu.memory_space<vmem>>, vector<64x128xf32>
    tpu.vector_store %arg4[%143, %c0_61], %142 {strides = array<i32>} : memref<512x128xf32, #tpu.memory_space<vmem>>, vector<64x128xf32>,
    %c1_i32_62 = arith.constant 1 : i32
    %c64_i32_63 = arith.constant 64 : i32
    %145 = arith.muli %c1_i32_62, %c64_i32_63 : i32
    %146 = tpu.assume_multiple %145, 64 : i32
    %147 = arith.index_cast %146 : i32 to index
    %c0_64 = arith.constant 0 : index
    %148 = vector.load %arg5[%147, %c0_64] : memref<512x128xf32, #tpu.memory_space<vmem>>, vector<64x128xf32>
    %149 = arith.mulf %148, %132 : vector<64x128xf32>
    %150 = arith.addf %149, %134 : vector<64x128xf32>
    %cst_65 = arith.constant 0.000000e+00 : f32
    %151 = vector.broadcast %cst_65 : f32 to vector<64x128xf32>
    %152 = arith.maximumf %150, %151 : vector<64x128xf32>
    %153 = arith.index_cast %146 : i32 to index
    %c0_66 = arith.constant 0 : index
    %154 = vector.load %arg4[%153, %c0_66] : memref<512x128xf32, #tpu.memory_space<vmem>>, vector<64x128xf32>
    tpu.vector_store %arg4[%153, %c0_66], %152 {strides = array<i32>} : memref<512x128xf32, #tpu.memory_space<vmem>>, vector<64x128xf32>,
    %c2_i32_67 = arith.constant 2 : i32
    %c64_i32_68 = arith.constant 64 : i32
    %155 = arith.muli %c2_i32_67, %c64_i32_68 : i32
    %156 = tpu.assume_multiple %155, 64 : i32
    %157 = arith.index_cast %156 : i32 to index
    %c0_69 = arith.constant 0 : index
    %158 = vector.load %arg5[%157, %c0_69] : memref<512x128xf32, #tpu.memory_space<vmem>>, vector<64x128xf32>
    %159 = arith.mulf %158, %132 : vector<64x128xf32>
    %160 = arith.addf %159, %134 : vector<64x128xf32>
    %cst_70 = arith.constant 0.000000e+00 : f32
    %161 = vector.broadcast %cst_70 : f32 to vector<64x128xf32>
    %162 = arith.maximumf %160, %161 : vector<64x128xf32>
    %163 = arith.index_cast %156 : i32 to index
    %c0_71 = arith.constant 0 : index
    %164 = vector.load %arg4[%163, %c0_71] : memref<512x128xf32, #tpu.memory_space<vmem>>, vector<64x128xf32>
    tpu.vector_store %arg4[%163, %c0_71], %162 {strides = array<i32>} : memref<512x128xf32, #tpu.memory_space<vmem>>, vector<64x128xf32>,
    %c3_i32_72 = arith.constant 3 : i32
    %c64_i32_73 = arith.constant 64 : i32
    %165 = arith.muli %c3_i32_72, %c64_i32_73 : i32
    %166 = tpu.assume_multiple %165, 64 : i32
    %167 = arith.index_cast %166 : i32 to index
    %c0_74 = arith.constant 0 : index
    %168 = vector.load %arg5[%167, %c0_74] : memref<512x128xf32, #tpu.memory_space<vmem>>, vector<64x128xf32>
    %169 = arith.mulf %168, %132 : vector<64x128xf32>
    %170 = arith.addf %169, %134 : vector<64x128xf32>
    %cst_75 = arith.constant 0.000000e+00 : f32
    %171 = vector.broadcast %cst_75 : f32 to vector<64x128xf32>
    %172 = arith.maximumf %170, %171 : vector<64x128xf32>
    %173 = arith.index_cast %166 : i32 to index
    %c0_76 = arith.constant 0 : index
    %174 = vector.load %arg4[%173, %c0_76] : memref<512x128xf32, #tpu.memory_space<vmem>>, vector<64x128xf32>
    tpu.vector_store %arg4[%173, %c0_76], %172 {strides = array<i32>} : memref<512x128xf32, #tpu.memory_space<vmem>>, vector<64x128xf32>,
    %c4_i32_77 = arith.constant 4 : i32
    %c64_i32_78 = arith.constant 64 : i32
    %175 = arith.muli %c4_i32_77, %c64_i32_78 : i32
    %176 = tpu.assume_multiple %175, 64 : i32
    %177 = arith.index_cast %176 : i32 to index
    %c0_79 = arith.constant 0 : index
    %178 = vector.load %arg5[%177, %c0_79] : memref<512x128xf32, #tpu.memory_space<vmem>>, vector<64x128xf32>
    %179 = arith.mulf %178, %132 : vector<64x128xf32>
    %180 = arith.addf %179, %134 : vector<64x128xf32>
    %cst_80 = arith.constant 0.000000e+00 : f32
    %181 = vector.broadcast %cst_80 : f32 to vector<64x128xf32>
    %182 = arith.maximumf %180, %181 : vector<64x128xf32>
    %183 = arith.index_cast %176 : i32 to index
    %c0_81 = arith.constant 0 : index
    %184 = vector.load %arg4[%183, %c0_81] : memref<512x128xf32, #tpu.memory_space<vmem>>, vector<64x128xf32>
    tpu.vector_store %arg4[%183, %c0_81], %182 {strides = array<i32>} : memref<512x128xf32, #tpu.memory_space<vmem>>, vector<64x128xf32>,
    %c5_i32_82 = arith.constant 5 : i32
    %c64_i32_83 = arith.constant 64 : i32
    %185 = arith.muli %c5_i32_82, %c64_i32_83 : i32
    %186 = tpu.assume_multiple %185, 64 : i32
    %187 = arith.index_cast %186 : i32 to index
    %c0_84 = arith.constant 0 : index
    %188 = vector.load %arg5[%187, %c0_84] : memref<512x128xf32, #tpu.memory_space<vmem>>, vector<64x128xf32>
    %189 = arith.mulf %188, %132 : vector<64x128xf32>
    %190 = arith.addf %189, %134 : vector<64x128xf32>
    %cst_85 = arith.constant 0.000000e+00 : f32
    %191 = vector.broadcast %cst_85 : f32 to vector<64x128xf32>
    %192 = arith.maximumf %190, %191 : vector<64x128xf32>
    %193 = arith.index_cast %186 : i32 to index
    %c0_86 = arith.constant 0 : index
    %194 = vector.load %arg4[%193, %c0_86] : memref<512x128xf32, #tpu.memory_space<vmem>>, vector<64x128xf32>
    tpu.vector_store %arg4[%193, %c0_86], %192 {strides = array<i32>} : memref<512x128xf32, #tpu.memory_space<vmem>>, vector<64x128xf32>,
    %c6_i32_87 = arith.constant 6 : i32
    %c64_i32_88 = arith.constant 64 : i32
    %195 = arith.muli %c6_i32_87, %c64_i32_88 : i32
    %196 = tpu.assume_multiple %195, 64 : i32
    %197 = arith.index_cast %196 : i32 to index
    %c0_89 = arith.constant 0 : index
    %198 = vector.load %arg5[%197, %c0_89] : memref<512x128xf32, #tpu.memory_space<vmem>>, vector<64x128xf32>
    %199 = arith.mulf %198, %132 : vector<64x128xf32>
    %200 = arith.addf %199, %134 : vector<64x128xf32>
    %cst_90 = arith.constant 0.000000e+00 : f32
    %201 = vector.broadcast %cst_90 : f32 to vector<64x128xf32>
    %202 = arith.maximumf %200, %201 : vector<64x128xf32>
    %203 = arith.index_cast %196 : i32 to index
    %c0_91 = arith.constant 0 : index
    %204 = vector.load %arg4[%203, %c0_91] : memref<512x128xf32, #tpu.memory_space<vmem>>, vector<64x128xf32>
    tpu.vector_store %arg4[%203, %c0_91], %202 {strides = array<i32>} : memref<512x128xf32, #tpu.memory_space<vmem>>, vector<64x128xf32>,
    %c7_i32_92 = arith.constant 7 : i32
    %c64_i32_93 = arith.constant 64 : i32
    %205 = arith.muli %c7_i32_92, %c64_i32_93 : i32
    %206 = tpu.assume_multiple %205, 64 : i32
    %207 = arith.index_cast %206 : i32 to index
    %c0_94 = arith.constant 0 : index
    %208 = vector.load %arg5[%207, %c0_94] : memref<512x128xf32, #tpu.memory_space<vmem>>, vector<64x128xf32>
    %209 = arith.mulf %208, %132 : vector<64x128xf32>
    %210 = arith.addf %209, %134 : vector<64x128xf32>
    %cst_95 = arith.constant 0.000000e+00 : f32
    %211 = vector.broadcast %cst_95 : f32 to vector<64x128xf32>
    %212 = arith.maximumf %210, %211 : vector<64x128xf32>
    %213 = arith.index_cast %206 : i32 to index
    %c0_96 = arith.constant 0 : index
    %214 = vector.load %arg4[%213, %c0_96] : memref<512x128xf32, #tpu.memory_space<vmem>>, vector<64x128xf32>
    tpu.vector_store %arg4[%213, %c0_96], %212 {strides = array<i32>} : memref<512x128xf32, #tpu.memory_space<vmem>>, vector<64x128xf32>,
    %c8_i32_97 = arith.constant 8 : i32
    return
  }
}

</mosaic_0001>

<bundles_post_ra>
// kernel: tpu_custom_call.1
= control target key start
LH: loop header
LB: loop body
LE: loop exit
PB: predicated region body
PF: predicated region fallthrough
CT: control target
= control target key end

     0   :  { %9 = vsyncpa [#allocation4], 0  ;;  %s3012_s0 = inlined_call_operand.hbm [shape: bf16[512,128], index: 0, kind: input, shape index: {}]   ;;  %s3013_s1 = inlined_call_operand.hbm [shape: bf16[128,128], index: 1, kind: input, shape index: {}]   ;;  %s3014_s2 = inlined_call_operand.vmem [shape: f32[1,128], index: 2, kind: input, shape index: {}]   ;;  %s3015_s3 = inlined_call_operand.vmem [shape: f32[1,128], index: 3, kind: input, shape index: {}]   ;;  %s3016_s4 = inlined_call_operand.hbm [shape: f32[512,128], index: 4, kind: output, shape index: {}]  }
   0x1   :  { %10 = vsyncpa [#allocation7], 0 }
   0x2   :  { %11 = vsyncpa [#allocation5], 0  ;;  %s2071_s15 = smov [#allocation3]   ;;  %s1999_s19 = scalar_lea.hbm %s3012_s0, 4096 }
   0x3   :  { %s17_s16 = sshll.u32 %s2071_s15, 4  ;;  %p2000_p0 = scmp.ne.s32.totalorder %s3012_s0, %s1999_s19  ;;  %s18_s16 = int_to_ptr.vmem [resolvable:$true] %s17_s16 }
   0x4   :  { %p2003_p1 = scmp.lt.u32.totalorder %s1999_s19, %s3012_s0 }
   0x6   :  { %p2005_p2 = pnand %p2003_p1, %p2000_p0 }
   0x8   :  { %2008 = shalt.err (!%p2005_p2)
}
   0x9   :  { %s2009_s24 = scalar_lea.vmem %s18_s16, 4096  ;;  %p2014_p4 = scmp.lt.s32.totalorder %s18_s16, %s18_s16 }
   0xa   :  { %p2010_p3 = scmp.ne.s32.totalorder %s18_s16, %s2009_s24  ;;  %p2015_p5 = scmp.lt.s32.totalorder %s2009_s24, %s2009_s24 }
   0xc   :  { %p2016_p6 = por %p2015_p5, %p2014_p4 }
   0xe   :  { %p2017_p7 = pnand %p2016_p6, %p2010_p3 }
  0x10   :  { %2020 = shalt.err (!%p2017_p7)
}
  0x11   :  { %s2072_s25 = smov 64   ;;  %s2073_s26 = smov 4  }
  0x12   :  { %23 = dma.hbm_to_vmem [thread:$0]  %s3012_s0, 4096, %s18_s16, [#allocation4], %s2072_s25, %s2072_s25, %s2073_s26  }
  0x13   :  { %s2074_s29 = smov [#allocation6]   ;;  %s2021_s7 = scalar_lea.hbm %s3013_s1, 1024 }
  0x14   :  { %s29_s30 = sshll.u32 %s2074_s29, 4  ;;  %p2022_p8 = scmp.ne.s32.totalorder %s3013_s1, %s2021_s7  ;;  %s30_s30 = int_to_ptr.vmem [resolvable:$true] %s29_s30 }
  0x15   :  { %p2025_p9 = scmp.lt.u32.totalorder %s2021_s7, %s3013_s1 }
  0x17   :  { %p2027_p10 = pnand %p2025_p9, %p2022_p8 }
  0x19   :  { %2030 = shalt.err (!%p2027_p10)
}
  0x1a   :  { %s2031_s12 = scalar_lea.vmem %s30_s30, 1024  ;;  %p2036_p12 = scmp.lt.s32.totalorder %s30_s30, %s30_s30 }
  0x1b   :  { %p2032_p11 = scmp.ne.s32.totalorder %s30_s30, %s2031_s12  ;;  %p2037_p13 = scmp.lt.s32.totalorder %s2031_s12, %s2031_s12 }
  0x1d   :  { %p2038_p0 = por %p2037_p13, %p2036_p12 }
  0x1f   :  { %p2039_p1 = pnand %p2038_p0, %p2032_p11 }
  0x21   :  { %2042 = shalt.err (!%p2039_p1)
}
  0x22   :  { %35 = dma.hbm_to_vmem [thread:$0]  %s3013_s1, 1024, %s30_s30, [#allocation7], %s2072_s25, %s2072_s25, %s2073_s26  }
  0x23   :  { %2065 = dma.done.wait [#allocation4], 4096  }
  0x24   :  { %2066 = vsyncadd [#allocation4], 4294963200 }
  0x25   :  { %2067 = dma.done.wait [#allocation7], 1024  }
  0x26   :  { %2068 = vsyncadd [#allocation7], 4294966272  ;;  %v2127_v0 = vld [vmem:[#allocation6] sm:$0xff]   ;;  %v2129_v1 = vld [vmem:[#allocation6 + $0x8] sm:$0xff]  }
  0x27   :  { %1758 = vmatprep.subr.bf16.mxu0 %v2127_v0  ;;  %1782 = vmatprep.subr.bf16.mxu1 %v2127_v0  ;;  %v2137_v2 = vld [vmem:[#allocation6 + $0x10] sm:$0xff]   ;;  %v2141_v3 = vld [vmem:[#allocation6 + $0x18] sm:$0xff]   ;;  %v1965_v4 = vld [vmem:[#allocation3] sm:$0xff]  }
  0x28   :  { %1759 = vmatpush3.bf16.msra.mxu0 %v2127_v0  ;;  %1783 = vmatpush3.bf16.msra.mxu1 %v2127_v0  ;;  %v1966_v5 = vld [vmem:[#allocation3 + $0x20] sm:$0xff]   ;;  %v2155_v7 = vld [vmem:[#allocation6 + $0x28] sm:$0xff]   ;;  %v2161_v8 = vld [vmem:[#allocation6 + $0x30] sm:$0xff]  }
  0x29   :  { %1760 = vmatprep.subr.bf16.mxu0 %v2129_v1  ;;  %1784 = vmatprep.subr.bf16.mxu1 %v2129_v1  ;;  %v2149_v6 = vld [vmem:[#allocation6 + $0x20] sm:$0xff]   ;;  %v2167_v9 = vld [vmem:[#allocation6 + $0x38] sm:$0xff]   ;;  %v1967_v10 = vld [vmem:[#allocation3 + $0x8] sm:$0xff]  }
  0x2a   :  { %1774 = vmatprep.mubr.bf16.mxu0 %v1965_v4  ;;  %1798 = vmatprep.mubr.bf16.mxu1 %v1966_v5  ;;  %v1968_v11 = vld [vmem:[#allocation3 + $0x28] sm:$0xff]   ;;  %v1969_v12 = vld [vmem:[#allocation3 + $0x10] sm:$0xff]   ;;  %v1971_v14 = vld [vmem:[#allocation3 + $0x18] sm:$0xff]  }
  0x2b   :  { %v1970_v13 = vld [vmem:[#allocation3 + $0x30] sm:$0xff]   ;;  %v1972_v15 = vld [vmem:[#allocation3 + $0x38] sm:$0xff]   ;;  %v1973_v16 = vld [vmem:[#allocation3 + $0x40] sm:$0xff]  }
  0x2c   :  { %1761 = vmatpush3.bf16.msra.mxu0 %v2129_v1  ;;  %1785 = vmatpush3.bf16.msra.mxu1 %v2129_v1  ;;  %v1974_v17 = vld [vmem:[#allocation3 + $0x60] sm:$0xff]   ;;  %v1975_v18 = vld [vmem:[#allocation3 + $0x48] sm:$0xff]   ;;  %v1977_v20 = vld [vmem:[#allocation3 + $0x50] sm:$0xff]  }
  0x2d   :  { %1762 = vmatprep.subr.bf16.mxu0 %v2137_v2  ;;  %1786 = vmatprep.subr.bf16.mxu1 %v2137_v2  ;;  %v1976_v19 = vld [vmem:[#allocation3 + $0x68] sm:$0xff]   ;;  %v1978_v21 = vld [vmem:[#allocation3 + $0x70] sm:$0xff]   ;;  %v1979_v22 = vld [vmem:[#allocation3 + $0x58] sm:$0xff]  }
  0x2e   :  { %v1980_v23 = vld [vmem:[#allocation3 + $0x78] sm:$0xff]   ;;  %v1981_v24 = vld [vmem:[#allocation3 + $0x80] sm:$0xff]   ;;  %v1983_v26 = vld [vmem:[#allocation3 + $0x88] sm:$0xff]  }
  0x2f   :  { %v1982_v25 = vld [vmem:[#allocation3 + $0xa0] sm:$0xff]   ;;  %v1984_v27 = vld [vmem:[#allocation3 + $0xa8] sm:$0xff]   ;;  %v1985_v28 = vld [vmem:[#allocation3 + $0x90] sm:$0xff]  }
  0x30   :  { %1763 = vmatpush3.bf16.msra.mxu0 %v2137_v2  ;;  %1787 = vmatpush3.bf16.msra.mxu1 %v2137_v2  ;;  %v1986_v29 = vld [vmem:[#allocation3 + $0xb0] sm:$0xff]   ;;  %v1987_v30 = vld [vmem:[#allocation3 + $0x98] sm:$0xff]   ;;  %v1989_v32 = vld [vmem:[#allocation3 + $0xc0] sm:$0xff]  }
  0x31   :  { %1764 = vmatprep.subr.bf16.mxu0 %v2141_v3  ;;  %1788 = vmatprep.subr.bf16.mxu1 %v2141_v3  ;;  %v1988_v31 = vld [vmem:[#allocation3 + $0xb8] sm:$0xff]   ;;  %v1990_v33 = vld [vmem:[#allocation3 + $0xe0] sm:$0xff]   ;;  %v1991_v34 = vld [vmem:[#allocation3 + $0xc8] sm:$0xff]  }
  0x32   :  { %v1992_v35 = vld [vmem:[#allocation3 + $0xe8] sm:$0xff]   ;;  %v1993_v36 = vld [vmem:[#allocation3 + $0xd0] sm:$0xff]   ;;  %v1995_v38 = vld [vmem:[#allocation3 + $0xd8] sm:$0xff]  }
  0x33   :  { %v1994_v37 = vld [vmem:[#allocation3 + $0xf0] sm:$0xff]   ;;  %v1996_v39 = vld [vmem:[#allocation3 + $0xf8] sm:$0xff]  }
  0x34   :  { %1765 = vmatpush3.bf16.msra.mxu0 %v2141_v3  ;;  %1789 = vmatpush3.bf16.msra.mxu1 %v2141_v3 }
  0x35   :  { %1766 = vmatprep.subr.bf16.mxu0 %v2149_v6  ;;  %1790 = vmatprep.subr.bf16.mxu1 %v2149_v6 }
  0x38   :  { %1767 = vmatpush3.bf16.msra.mxu0 %v2149_v6  ;;  %1791 = vmatpush3.bf16.msra.mxu1 %v2149_v6 }
  0x39   :  { %1768 = vmatprep.subr.bf16.mxu0 %v2155_v7  ;;  %1792 = vmatprep.subr.bf16.mxu1 %v2155_v7 }
  0x3c   :  { %1769 = vmatpush3.bf16.msra.mxu0 %v2155_v7  ;;  %1793 = vmatpush3.bf16.msra.mxu1 %v2155_v7 }
  0x3d   :  { %1770 = vmatprep.subr.bf16.mxu0 %v2161_v8  ;;  %1794 = vmatprep.subr.bf16.mxu1 %v2161_v8 }
  0x40   :  { %1771 = vmatpush3.bf16.msra.mxu0 %v2161_v8  ;;  %1795 = vmatpush3.bf16.msra.mxu1 %v2161_v8 }
  0x41   :  { %1772 = vmatprep.subr.bf16.mxu0 %v2167_v9  ;;  %1796 = vmatprep.subr.bf16.mxu1 %v2167_v9 }
  0x44   :  { %1773 = vmatpush3.bf16.msra.mxu0 %v2167_v9  ;;  %1797 = vmatpush3.bf16.msra.mxu1 %v2167_v9 }
  0x45   :  { %1806 = vmatprep.subr.bf16.mxu0 %v2127_v0  ;;  %1830 = vmatprep.subr.bf16.mxu1 %v2127_v0 }
  0x47   :  { %1775 = vmatmul.mubr.bf16.vlgmr.msra.gmra.mrb[0].mxu0 %v1967_v10  ;;  %1799 = vmatmul.mubr.bf16.vlgmr.msra.gmra.mrb[0].mxu1 %v1968_v11 }
  0x48   :  { %1807 = vmatpush3.bf16.msra.mxu0 %v2127_v0  ;;  %1831 = vmatpush3.bf16.msra.mxu1 %v2127_v0 }
  0x49   :  { %1808 = vmatprep.subr.bf16.mxu0 %v2129_v1  ;;  %1832 = vmatprep.subr.bf16.mxu1 %v2129_v1 }
  0x4a   :  { %1778 = vmatprep.mubr.bf16.mxu0 %v1969_v12  ;;  %1802 = vmatprep.mubr.bf16.mxu1 %v1970_v13 }
  0x4c   :  { %1809 = vmatpush3.bf16.msra.mxu0 %v2129_v1  ;;  %1833 = vmatpush3.bf16.msra.mxu1 %v2129_v1 }
  0x4d   :  { %1810 = vmatprep.subr.bf16.mxu0 %v2137_v2  ;;  %1834 = vmatprep.subr.bf16.mxu1 %v2137_v2 }
  0x4f   :  { %1779 = vmatmul.mubr.bf16.gmra.mrb[4].mxu0 %v1971_v14  ;;  %1803 = vmatmul.mubr.bf16.gmra.mrb[4].mxu1 %v1972_v15 }
  0x50   :  { %1811 = vmatpush3.bf16.msra.mxu0 %v2137_v2  ;;  %1835 = vmatpush3.bf16.msra.mxu1 %v2137_v2 }
  0x51   :  { %1812 = vmatprep.subr.bf16.mxu0 %v2141_v3  ;;  %1836 = vmatprep.subr.bf16.mxu1 %v2141_v3 }
  0x52   :  { %1822 = vmatprep.mubr.bf16.mxu0 %v1973_v16  ;;  %1846 = vmatprep.mubr.bf16.mxu1 %v1974_v17 }
  0x54   :  { %1813 = vmatpush3.bf16.msra.mxu0 %v2141_v3  ;;  %1837 = vmatpush3.bf16.msra.mxu1 %v2141_v3 }
  0x55   :  { %1814 = vmatprep.subr.bf16.mxu0 %v2149_v6  ;;  %1838 = vmatprep.subr.bf16.mxu1 %v2149_v6 }
  0x58   :  { %1815 = vmatpush3.bf16.msra.mxu0 %v2149_v6  ;;  %1839 = vmatpush3.bf16.msra.mxu1 %v2149_v6 }
  0x59   :  { %1816 = vmatprep.subr.bf16.mxu0 %v2155_v7  ;;  %1840 = vmatprep.subr.bf16.mxu1 %v2155_v7 }
  0x5c   :  { %1817 = vmatpush3.bf16.msra.mxu0 %v2155_v7  ;;  %1841 = vmatpush3.bf16.msra.mxu1 %v2155_v7 }
  0x5d   :  { %1818 = vmatprep.subr.bf16.mxu0 %v2161_v8  ;;  %1842 = vmatprep.subr.bf16.mxu1 %v2161_v8 }
  0x60   :  { %1819 = vmatpush3.bf16.msra.mxu0 %v2161_v8  ;;  %1843 = vmatpush3.bf16.msra.mxu1 %v2161_v8 }
  0x61   :  { %1820 = vmatprep.subr.bf16.mxu0 %v2167_v9  ;;  %1844 = vmatprep.subr.bf16.mxu1 %v2167_v9 }
  0x64   :  { %1821 = vmatpush3.bf16.msra.mxu0 %v2167_v9  ;;  %1845 = vmatpush3.bf16.msra.mxu1 %v2167_v9 }
  0x65   :  { %1854 = vmatprep.subr.bf16.mxu0 %v2127_v0  ;;  %1878 = vmatprep.subr.bf16.mxu1 %v2127_v0 }
  0x67   :  { %1823 = vmatmul.mubr.bf16.vlgmr.msra.gmra.mrb[8].mxu0 %v1975_v18  ;;  %1847 = vmatmul.mubr.bf16.vlgmr.msra.gmra.mrb[8].mxu1 %v1976_v19 }
  0x68   :  { %1855 = vmatpush3.bf16.msra.mxu0 %v2127_v0  ;;  %1879 = vmatpush3.bf16.msra.mxu1 %v2127_v0 }
  0x69   :  { %1856 = vmatprep.subr.bf16.mxu0 %v2129_v1  ;;  %1880 = vmatprep.subr.bf16.mxu1 %v2129_v1 }
  0x6a   :  { %1826 = vmatprep.mubr.bf16.mxu0 %v1977_v20  ;;  %1850 = vmatprep.mubr.bf16.mxu1 %v1978_v21 }
  0x6c   :  { %1857 = vmatpush3.bf16.msra.mxu0 %v2129_v1  ;;  %1881 = vmatpush3.bf16.msra.mxu1 %v2129_v1 }
  0x6d   :  { %1858 = vmatprep.subr.bf16.mxu0 %v2137_v2  ;;  %1882 = vmatprep.subr.bf16.mxu1 %v2137_v2 }
  0x6f   :  { %1827 = vmatmul.mubr.bf16.gmra.mrb[12].mxu0 %v1979_v22  ;;  %1851 = vmatmul.mubr.bf16.gmra.mrb[12].mxu1 %v1980_v23 }
  0x70   :  { %1859 = vmatpush3.bf16.msra.mxu0 %v2137_v2  ;;  %1883 = vmatpush3.bf16.msra.mxu1 %v2137_v2 }
  0x71   :  { %1860 = vmatprep.subr.bf16.mxu0 %v2141_v3  ;;  %1884 = vmatprep.subr.bf16.mxu1 %v2141_v3 }
  0x72   :  { %1870 = vmatprep.mubr.bf16.mxu0 %v1981_v24  ;;  %1894 = vmatprep.mubr.bf16.mxu1 %v1982_v25 }
  0x74   :  { %1861 = vmatpush3.bf16.msra.mxu0 %v2141_v3  ;;  %1885 = vmatpush3.bf16.msra.mxu1 %v2141_v3 }
  0x75   :  { %1862 = vmatprep.subr.bf16.mxu0 %v2149_v6  ;;  %1886 = vmatprep.subr.bf16.mxu1 %v2149_v6 }
  0x78   :  { %1863 = vmatpush3.bf16.msra.mxu0 %v2149_v6  ;;  %1887 = vmatpush3.bf16.msra.mxu1 %v2149_v6 }
  0x79   :  { %1864 = vmatprep.subr.bf16.mxu0 %v2155_v7  ;;  %1888 = vmatprep.subr.bf16.mxu1 %v2155_v7 }
  0x7c   :  { %1865 = vmatpush3.bf16.msra.mxu0 %v2155_v7  ;;  %1889 = vmatpush3.bf16.msra.mxu1 %v2155_v7 }
  0x7d   :  { %1866 = vmatprep.subr.bf16.mxu0 %v2161_v8  ;;  %1890 = vmatprep.subr.bf16.mxu1 %v2161_v8 }
  0x80   :  { %1867 = vmatpush3.bf16.msra.mxu0 %v2161_v8  ;;  %1891 = vmatpush3.bf16.msra.mxu1 %v2161_v8 }
  0x81   :  { %1868 = vmatprep.subr.bf16.mxu0 %v2167_v9  ;;  %1892 = vmatprep.subr.bf16.mxu1 %v2167_v9 }
  0x84   :  { %1869 = vmatpush3.bf16.msra.mxu0 %v2167_v9  ;;  %1893 = vmatpush3.bf16.msra.mxu1 %v2167_v9 }
  0x85   :  { %1902 = vmatprep.subr.bf16.mxu0 %v2127_v0  ;;  %1926 = vmatprep.subr.bf16.mxu1 %v2127_v0 }
  0x87   :  { %1871 = vmatmul.mubr.bf16.vlgmr.msra.gmra.mrb[16].mxu0 %v1983_v26  ;;  %1895 = vmatmul.mubr.bf16.vlgmr.msra.gmra.mrb[16].mxu1 %v1984_v27 }
  0x88   :  { %1903 = vmatpush3.bf16.msra.mxu0 %v2127_v0  ;;  %1927 = vmatpush3.bf16.msra.mxu1 %v2127_v0 }
  0x89   :  { %1904 = vmatprep.subr.bf16.mxu0 %v2129_v1  ;;  %1928 = vmatprep.subr.bf16.mxu1 %v2129_v1 }
  0x8a   :  { %1874 = vmatprep.mubr.bf16.mxu0 %v1985_v28  ;;  %1898 = vmatprep.mubr.bf16.mxu1 %v1986_v29 }
  0x8c   :  { %1905 = vmatpush3.bf16.msra.mxu0 %v2129_v1  ;;  %1929 = vmatpush3.bf16.msra.mxu1 %v2129_v1 }
  0x8d   :  { %1906 = vmatprep.subr.bf16.mxu0 %v2137_v2  ;;  %1930 = vmatprep.subr.bf16.mxu1 %v2137_v2 }
  0x8f   :  { %1875 = vmatmul.mubr.bf16.gmra.mrb[20].mxu0 %v1987_v30  ;;  %1899 = vmatmul.mubr.bf16.gmra.mrb[20].mxu1 %v1988_v31 }
  0x90   :  { %1907 = vmatpush3.bf16.msra.mxu0 %v2137_v2  ;;  %1931 = vmatpush3.bf16.msra.mxu1 %v2137_v2 }
  0x91   :  { %1908 = vmatprep.subr.bf16.mxu0 %v2141_v3  ;;  %1932 = vmatprep.subr.bf16.mxu1 %v2141_v3 }
  0x92   :  { %1918 = vmatprep.mubr.bf16.mxu0 %v1989_v32  ;;  %1942 = vmatprep.mubr.bf16.mxu1 %v1990_v33 }
  0x94   :  { %1909 = vmatpush3.bf16.msra.mxu0 %v2141_v3  ;;  %1933 = vmatpush3.bf16.msra.mxu1 %v2141_v3 }
  0x95   :  { %1910 = vmatprep.subr.bf16.mxu0 %v2149_v6  ;;  %1934 = vmatprep.subr.bf16.mxu1 %v2149_v6 }
  0x98   :  { %1911 = vmatpush3.bf16.msra.mxu0 %v2149_v6  ;;  %1935 = vmatpush3.bf16.msra.mxu1 %v2149_v6 }
  0x99   :  { %1912 = vmatprep.subr.bf16.mxu0 %v2155_v7  ;;  %1936 = vmatprep.subr.bf16.mxu1 %v2155_v7 }
  0x9c   :  { %1913 = vmatpush3.bf16.msra.mxu0 %v2155_v7  ;;  %1937 = vmatpush3.bf16.msra.mxu1 %v2155_v7 }
  0x9d   :  { %1914 = vmatprep.subr.bf16.mxu0 %v2161_v8  ;;  %1938 = vmatprep.subr.bf16.mxu1 %v2161_v8 }
  0xa0   :  { %1915 = vmatpush3.bf16.msra.mxu0 %v2161_v8  ;;  %1939 = vmatpush3.bf16.msra.mxu1 %v2161_v8 }
  0xa1   :  { %1916 = vmatprep.subr.bf16.mxu0 %v2167_v9  ;;  %1940 = vmatprep.subr.bf16.mxu1 %v2167_v9 }
  0xa4   :  { %1917 = vmatpush3.bf16.msra.mxu0 %v2167_v9  ;;  %1941 = vmatpush3.bf16.msra.mxu1 %v2167_v9 }
  0xa7   :  { %1919 = vmatmul.mubr.bf16.vlgmr.msra.gmra.mrb[24].mxu0 %v1991_v34  ;;  %1943 = vmatmul.mubr.bf16.vlgmr.msra.gmra.mrb[24].mxu1 %v1992_v35 }
  0xa8   :  { %1922 = vmatprep.mubr.bf16.mxu0 %v1993_v36  ;;  %1946 = vmatprep.mubr.bf16.mxu1 %v1994_v37 }
  0xaf   :  { %1923 = vmatmul.mubr.bf16.gmra.mrb[28].mxu0 %v1995_v38  ;;  %1947 = vmatmul.mubr.bf16.gmra.mrb[28].mxu1 %v1996_v39 }
 0x11a   :  { %v2271_v40 = vpop.f32.mrb[0].mxu0  ;;  %v2273_v41 = vpop.f32.mrb[0].mxu1 }
 0x11b   :  { %v2275_v42 = vpop.f32.mrb[1].mxu0  ;;  %v2277_v43 = vpop.f32.mrb[1].mxu1  ;;  %v232_v54 = vmul.f32 %v2271_v40, %v2271_v40  ;;  %v375_v55 = vmul.f32 %v2273_v41, %v2273_v41 }
 0x11c   :  { %v373_v44 = vmul.f32 %v2277_v43, %v2277_v43  ;;  %v2281_v45 = vpop.f32.mrb[2].mxu0  ;;  %v2283_v46 = vpop.f32.mrb[2].mxu1  ;;  %v230_v47 = vmul.f32 %v2275_v42, %v2275_v42 }
 0x11d   :  { %v2287_v48 = vpop.f32.mrb[3].mxu0  ;;  %v2289_v49 = vpop.f32.mrb[3].mxu1  ;;  %v233_v60 = vmul.f32 %v2281_v45, %v2281_v45  ;;  %v376_v3 = vmul.f32 %v2283_v46, %v2283_v46 }
 0x11e   :  { %v216_v50 = vadd.f32 %v2287_v48, %v2275_v42  ;;  %v231_v51 = vmul.f32 %v2287_v48, %v2287_v48  ;;  %v359_v52 = vadd.f32 %v2289_v49, %v2277_v43  ;;  %v374_v53 = vmul.f32 %v2289_v49, %v2289_v49 }
 0x120   :  { %v217_v56 = vadd.f32 %v2271_v40, %v216_v50  ;;  %v238_v57 = vadd.f32 %v231_v51, %v230_v47  ;;  %v360_v58 = vadd.f32 %v2273_v41, %v359_v52  ;;  %v381_v59 = vadd.f32 %v374_v53, %v373_v44 }
 0x122   :  { %v239_v61 = vadd.f32 %v238_v57, %v232_v54  ;;  %v382_v62 = vadd.f32 %v381_v59, %v375_v55  ;;  %v2307_v63 = vpop.f32.mrb[4].mxu0  ;;  %v2309_v0 = vpop.f32.mrb[4].mxu1  ;;  %v218_v1 = vadd.f32 %v2281_v45, %v217_v56  ;;  %v361_v2 = vadd.f32 %v2283_v46, %v360_v58 }
 0x123   :  { %v2315_v4 = vpop.f32.mrb[5].mxu0  ;;  %v2317_v5 = vpop.f32.mrb[5].mxu1  ;;  %v236_v12 = vmul.f32 %v2307_v63, %v2307_v63  ;;  %v379_v21 = vmul.f32 %v2309_v0, %v2309_v0 }
 0x124   :  { %v219_v6 = vadd.f32 %v218_v1, %v2315_v4  ;;  %v234_v7 = vmul.f32 %v2315_v4, %v2315_v4  ;;  %v240_v8 = vadd.f32 %v239_v61, %v233_v60  ;;  %v362_v9 = vadd.f32 %v361_v2, %v2317_v5  ;;  %v2323_v10 = vpop.f32.mrb[6].mxu0  ;;  %v2325_v11 = vpop.f32.mrb[6].mxu1 }
 0x125   :  { %v377_v13 = vmul.f32 %v2317_v5, %v2317_v5  ;;  %v383_v14 = vadd.f32 %v382_v62, %v376_v3  ;;  %v2331_v15 = vpop.f32.mrb[7].mxu0  ;;  %v2333_v16 = vpop.f32.mrb[7].mxu1  ;;  %v237_v24 = vmul.f32 %v2323_v10, %v2323_v10  ;;  %v380_v28 = vmul.f32 %v2325_v11, %v2325_v11 }
 0x126   :  { %v241_v17 = vadd.f32 %v240_v8, %v234_v7  ;;  %v220_v18 = vadd.f32 %v219_v6, %v2331_v15  ;;  %v235_v19 = vmul.f32 %v2331_v15, %v2331_v15  ;;  %v363_v20 = vadd.f32 %v362_v9, %v2333_v16 }
 0x127   :  { %v384_v22 = vadd.f32 %v383_v14, %v377_v13  ;;  %v378_v23 = vmul.f32 %v2333_v16, %v2333_v16 }
 0x128   :  { %v221_v25 = vadd.f32 %v2307_v63, %v220_v18  ;;  %v242_v26 = vadd.f32 %v241_v17, %v235_v19  ;;  %v364_v27 = vadd.f32 %v2309_v0, %v363_v20 }
 0x129   :  { %v385_v29 = vadd.f32 %v384_v22, %v378_v23 }
 0x12a   :  { %v222_v30 = vadd.f32 %v2323_v10, %v221_v25  ;;  %v243_v31 = vadd.f32 %v242_v26, %v236_v12  ;;  %v365_v32 = vadd.f32 %v2325_v11, %v364_v27 }
 0x12b   :  { %v386_v33 = vadd.f32 %v385_v29, %v379_v21 }
 0x12c   :  { %v223_v34 = vrot.slane %v222_v30, 4  ;;  %v244_v35 = vadd.f32 %v243_v31, %v237_v24  ;;  %v366_v36 = vrot.slane %v365_v32, 4 }
 0x12d   :  { %v387_v37 = vadd.f32 %v386_v33, %v380_v28 }
 0x12e   :  { %v224_v38 = vadd.f32 %v223_v34, %v222_v30  ;;  %v245_v39 = vrot.slane %v244_v35, 4  ;;  %v367_v44 = vadd.f32 %v366_v36, %v365_v32 }
 0x12f   :  { %v388_v47 = vrot.slane %v387_v37, 4 }
 0x130   :  { %v225_v50 = vrot.slane %v224_v38, 2  ;;  %v246_v51 = vadd.f32 %v245_v39, %v244_v35  ;;  %v368_v52 = vrot.slane %v367_v44, 2 }
 0x131   :  { %v389_v53 = vadd.f32 %v388_v47, %v387_v37 }
 0x132   :  { %v226_v54 = vadd.f32 %v225_v50, %v224_v38  ;;  %v247_v55 = vrot.slane %v246_v51, 2  ;;  %v369_v56 = vadd.f32 %v368_v52, %v367_v44 }
 0x133   :  { %v390_v57 = vrot.slane %v389_v53, 2 }
 0x134   :  { %v227_v58 = vrot.slane %v226_v54, 1  ;;  %v248_v59 = vadd.f32 %v247_v55, %v246_v51  ;;  %v370_v60 = vrot.slane %v369_v56, 1 }
 0x135   :  { %v391_v61 = vadd.f32 %v390_v57, %v389_v53 }
 0x136   :  { %v228_v62 = vadd.f32 %v227_v58, %v226_v54  ;;  %v249_v1 = vrot.slane %v248_v59, 1  ;;  %v371_v2 = vadd.f32 %v370_v60, %v369_v56 }
 0x137   :  { %v392_v3 = vrot.slane %v391_v61, 1 }
 0x138   :  { %v250_v6 = vadd.f32 %v249_v1, %v248_v59  ;;  %v2351_v7 = vadd.f32 %v371_v2, %v228_v62 }
 0x139   :  { %v393_v8 = vadd.f32 %v392_v3, %v391_v61 }
 0x13a   :  { %v2353_v9 = vpop.f32.mrb[8].mxu0  ;;  %v2355_v12 = vpop.f32.mrb[8].mxu1 }
 0x13b   :  { %v2357_v13 = vadd.f32 %v393_v8, %v250_v6  ;;  %v2359_v14 = vpop.f32.mrb[9].mxu0  ;;  %v2361_v17 = vpop.f32.mrb[9].mxu1  ;;  %v518_v28 = vmul.f32 %v2353_v9, %v2353_v9  ;;  %v661_v29 = vmul.f32 %v2355_v12, %v2355_v12 }
 0x13c   :  { %v659_v18 = vmul.f32 %v2361_v17, %v2361_v17  ;;  %v2365_v19 = vpop.f32.mrb[10].mxu0  ;;  %v2367_v20 = vpop.f32.mrb[10].mxu1  ;;  %v516_v21 = vmul.f32 %v2359_v14, %v2359_v14 }
 0x13d   :  { %v2371_v22 = vpop.f32.mrb[11].mxu0  ;;  %v2373_v23 = vpop.f32.mrb[11].mxu1  ;;  %v519_v34 = vmul.f32 %v2365_v19, %v2365_v19  ;;  %v662_v47 = vmul.f32 %v2367_v20, %v2367_v20 }
 0x13e   :  { %v502_v24 = vadd.f32 %v2371_v22, %v2359_v14  ;;  %v517_v25 = vmul.f32 %v2371_v22, %v2371_v22  ;;  %v645_v26 = vadd.f32 %v2373_v23, %v2361_v17  ;;  %v660_v27 = vmul.f32 %v2373_v23, %v2373_v23 }
 0x140   :  { %v503_v30 = vadd.f32 %v2353_v9, %v502_v24  ;;  %v524_v31 = vadd.f32 %v517_v25, %v516_v21  ;;  %v646_v32 = vadd.f32 %v2355_v12, %v645_v26  ;;  %v667_v33 = vadd.f32 %v660_v27, %v659_v18 }
 0x142   :  { %v525_v35 = vadd.f32 %v524_v31, %v518_v28  ;;  %v668_v36 = vadd.f32 %v667_v33, %v661_v29  ;;  %v2391_v37 = vpop.f32.mrb[12].mxu0  ;;  %v2393_v38 = vpop.f32.mrb[12].mxu1  ;;  %v504_v39 = vadd.f32 %v2365_v19, %v503_v30  ;;  %v647_v44 = vadd.f32 %v2367_v20, %v646_v32 }
 0x143   :  { %v2399_v50 = vpop.f32.mrb[13].mxu0  ;;  %v2401_v51 = vpop.f32.mrb[13].mxu1  ;;  %v522_v58 = vmul.f32 %v2391_v37, %v2391_v37  ;;  %v665_v8 = vmul.f32 %v2393_v38, %v2393_v38 }
 0x144   :  { %v505_v52 = vadd.f32 %v504_v39, %v2399_v50  ;;  %v520_v53 = vmul.f32 %v2399_v50, %v2399_v50  ;;  %v526_v54 = vadd.f32 %v525_v35, %v519_v34  ;;  %v648_v55 = vadd.f32 %v647_v44, %v2401_v51  ;;  %v2407_v56 = vpop.f32.mrb[14].mxu0  ;;  %v2409_v57 = vpop.f32.mrb[14].mxu1 }
 0x145   :  { %v663_v59 = vmul.f32 %v2401_v51, %v2401_v51  ;;  %v669_v60 = vadd.f32 %v668_v36, %v662_v47  ;;  %v2415_v61 = vpop.f32.mrb[15].mxu0  ;;  %v2417_v62 = vpop.f32.mrb[15].mxu1  ;;  %v523_v24 = vmul.f32 %v2407_v56, %v2407_v56  ;;  %v666_v28 = vmul.f32 %v2409_v57, %v2409_v57 }
 0x146   :  { %v527_v1 = vadd.f32 %v526_v54, %v520_v53  ;;  %v506_v2 = vadd.f32 %v505_v52, %v2415_v61  ;;  %v521_v3 = vmul.f32 %v2415_v61, %v2415_v61  ;;  %v649_v6 = vadd.f32 %v648_v55, %v2417_v62 }
 0x147   :  { %v670_v18 = vadd.f32 %v669_v60, %v663_v59  ;;  %v664_v21 = vmul.f32 %v2417_v62, %v2417_v62 }
 0x148   :  { %v507_v25 = vadd.f32 %v2391_v37, %v506_v2  ;;  %v528_v26 = vadd.f32 %v527_v1, %v521_v3  ;;  %v650_v27 = vadd.f32 %v2393_v38, %v649_v6 }
 0x149   :  { %v671_v29 = vadd.f32 %v670_v18, %v664_v21 }
 0x14a   :  { %v508_v30 = vadd.f32 %v2407_v56, %v507_v25  ;;  %v529_v31 = vadd.f32 %v528_v26, %v522_v58  ;;  %v651_v32 = vadd.f32 %v2409_v57, %v650_v27 }
 0x14b   :  { %v672_v33 = vadd.f32 %v671_v29, %v665_v8 }
 0x14c   :  { %v509_v34 = vrot.slane %v508_v30, 4  ;;  %v530_v35 = vadd.f32 %v529_v31, %v523_v24  ;;  %v652_v36 = vrot.slane %v651_v32, 4 }
 0x14d   :  { %v673_v39 = vadd.f32 %v672_v33, %v666_v28 }
 0x14e   :  { %v510_v44 = vadd.f32 %v509_v34, %v508_v30  ;;  %v531_v47 = vrot.slane %v530_v35, 4  ;;  %v653_v52 = vadd.f32 %v652_v36, %v651_v32 }
 0x14f   :  { %v674_v53 = vrot.slane %v673_v39, 4 }
 0x150   :  { %v511_v54 = vrot.slane %v510_v44, 2  ;;  %v532_v55 = vadd.f32 %v531_v47, %v530_v35  ;;  %v654_v59 = vrot.slane %v653_v52, 2 }
 0x151   :  { %v675_v60 = vadd.f32 %v674_v53, %v673_v39 }
 0x152   :  { %v512_v1 = vadd.f32 %v511_v54, %v510_v44  ;;  %v533_v2 = vrot.slane %v532_v55, 2  ;;  %v655_v3 = vadd.f32 %v654_v59, %v653_v52 }
 0x153   :  { %v676_v6 = vrot.slane %v675_v60, 2 }
 0x154   :  { %v513_v58 = vrot.slane %v512_v1, 1  ;;  %v534_v18 = vadd.f32 %v533_v2, %v532_v55  ;;  %v656_v21 = vrot.slane %v655_v3, 1 }
 0x155   :  { %v677_v8 = vadd.f32 %v676_v6, %v675_v60 }
 0x156   :  { %v514_v25 = vadd.f32 %v513_v58, %v512_v1  ;;  %v535_v24 = vrot.slane %v534_v18, 1  ;;  %v657_v29 = vadd.f32 %v656_v21, %v655_v3 }
 0x157   :  { %v678_v26 = vrot.slane %v677_v8, 1 }
 0x158   :  { %v515_v27 = vadd.f32 %v514_v25, %v2351_v7  ;;  %v536_v28 = vadd.f32 %v535_v24, %v534_v18 }
 0x159   :  { %v679_v32 = vadd.f32 %v678_v26, %v677_v8 }
 0x15a   :  { %v537_v30 = vadd.f32 %v536_v28, %v2357_v13  ;;  %v2437_v31 = vadd.f32 %v657_v29, %v515_v27  ;;  %v2439_v33 = vpop.f32.mrb[16].mxu0  ;;  %v2441_v34 = vpop.f32.mrb[16].mxu1 }
 0x15b   :  { %3046 = vst [vmem:[#allocation12_spill] sm:$0xff] %v2439_v33  ;;  %3047 = vst [vmem:[#allocation13_spill] sm:$0xff] %v2441_v34  ;;  %v2443_v35 = vpop.f32.mrb[17].mxu0  ;;  %v2445_v36 = vpop.f32.mrb[17].mxu1  ;;  %v804_v1 = vmul.f32 %v2439_v33, %v2439_v33  ;;  %v947_v2 = vmul.f32 %v2441_v34, %v2441_v34 }
 0x15c   :  { %3048 = vst [vmem:[#allocation14_spill] sm:$0xff] %v2445_v36  ;;  %v2447_v39 = vadd.f32 %v679_v32, %v537_v30  ;;  %v945_v7 = vmul.f32 %v2445_v36, %v2445_v36  ;;  %v2451_v44 = vpop.f32.mrb[18].mxu0  ;;  %v2453_v47 = vpop.f32.mrb[18].mxu1  ;;  %v802_v13 = vmul.f32 %v2443_v35, %v2443_v35 }
 0x15d   :  { %3049 = vst [vmem:[#allocation15_spill] sm:$0xff] %v2451_v44  ;;  %3050 = vst [vmem:[#allocation16_spill] sm:$0xff] %v2453_v47  ;;  %v2457_v52 = vpop.f32.mrb[19].mxu0  ;;  %v2459_v53 = vpop.f32.mrb[19].mxu1  ;;  %v805_v21 = vmul.f32 %v2451_v44, %v2451_v44  ;;  %v948_v29 = vmul.f32 %v2453_v47, %v2453_v47 }
 0x15e   :  { %3051 = vst [vmem:[#allocation17_spill] sm:$0xff] %v2457_v52  ;;  %3052 = vst [vmem:[#allocation18_spill] sm:$0xff] %v2459_v53  ;;  %v788_v54 = vadd.f32 %v2457_v52, %v2443_v35  ;;  %v803_v55 = vmul.f32 %v2457_v52, %v2457_v52  ;;  %v931_v59 = vadd.f32 %v2459_v53, %v2445_v36 }
 0x15f   :  { %v946_v60 = vmul.f32 %v2459_v53, %v2459_v53 }
 0x160   :  { %v789_v3 = vadd.f32 %v2439_v33, %v788_v54  ;;  %v810_v6 = vadd.f32 %v803_v55, %v802_v13  ;;  %v932_v58 = vadd.f32 %v2441_v34, %v931_v59 }
 0x161   :  { %v953_v18 = vadd.f32 %v946_v60, %v945_v7 }
 0x162   :  { %v811_v8 = vadd.f32 %v810_v6, %v804_v1  ;;  %v2477_v24 = vpop.f32.mrb[20].mxu0  ;;  %v2479_v26 = vpop.f32.mrb[20].mxu1  ;;  %v790_v27 = vadd.f32 %v2451_v44, %v789_v3  ;;  %v933_v28 = vadd.f32 %v2453_v47, %v932_v58 }
 0x163   :  { %v954_v25 = vadd.f32 %v953_v18, %v947_v2  ;;  %3053 = vst [vmem:[#allocation19_spill] sm:$0xff] %v2477_v24  ;;  %3054 = vst [vmem:[#allocation20_spill] sm:$0xff] %v2479_v26  ;;  %v2485_v30 = vpop.f32.mrb[21].mxu0  ;;  %v2487_v32 = vpop.f32.mrb[21].mxu1  ;;  %v808_v1 = vmul.f32 %v2477_v24, %v2477_v24 }
 0x164   :  { %3055 = vst [vmem:[#allocation21_spill] sm:$0xff] %v2485_v30  ;;  %3056 = vst [vmem:[#allocation22_spill] sm:$0xff] %v2487_v32  ;;  %v791_v7 = vadd.f32 %v790_v27, %v2485_v30  ;;  %v806_v13 = vmul.f32 %v2485_v30, %v2485_v30  ;;  %v812_v54 = vadd.f32 %v811_v8, %v805_v21  ;;  %v2493_v59 = vpop.f32.mrb[22].mxu0  ;;  %v2495_v60 = vpop.f32.mrb[22].mxu1 }
 0x165   :  { %v934_v55 = vadd.f32 %v933_v28, %v2487_v32  ;;  %3057 = vst [vmem:[#allocation23_spill] sm:$0xff] %v2495_v60  ;;  %v949_v2 = vmul.f32 %v2487_v32, %v2487_v32  ;;  %v955_v3 = vadd.f32 %v954_v25, %v948_v29  ;;  %v2501_v6 = vpop.f32.mrb[23].mxu0  ;;  %v2503_v58 = vpop.f32.mrb[23].mxu1  ;;  %v951_v28 = vmul.f32 %v2479_v26, %v2479_v26 }
 0x166   :  { %3058 = vst [vmem:[#allocation24_spill] sm:$0xff] %v2501_v6  ;;  %3059 = vst [vmem:[#allocation25_spill] sm:$0xff] %v2503_v58  ;;  %v813_v18 = vadd.f32 %v812_v54, %v806_v13  ;;  %v792_v21 = vadd.f32 %v791_v7, %v2501_v6  ;;  %v807_v8 = vmul.f32 %v2501_v6, %v2501_v6 }
 0x167   :  { %v935_v27 = vadd.f32 %v934_v55, %v2503_v58  ;;  %v956_v47 = vadd.f32 %v955_v3, %v949_v2  ;;  %v950_v32 = vmul.f32 %v2503_v58, %v2503_v58  ;;  %v809_v25 = vmul.f32 %v2493_v59, %v2493_v59 }
 0x168   :  { %v793_v29 = vadd.f32 %v2477_v24, %v792_v21  ;;  %v814_v13 = vadd.f32 %v813_v18, %v807_v8  ;;  %v952_v54 = vmul.f32 %v2495_v60, %v2495_v60 }
 0x169   :  { %v936_v7 = vadd.f32 %v2479_v26, %v935_v27  ;;  %v957_v34 = vadd.f32 %v956_v47, %v950_v32 }
 0x16a   :  { %v794_v55 = vadd.f32 %v2493_v59, %v793_v29  ;;  %v815_v53 = vadd.f32 %v814_v13, %v808_v1 }
 0x16b   :  { %v937_v2 = vadd.f32 %v2495_v60, %v936_v7  ;;  %v958_v3 = vadd.f32 %v957_v34, %v951_v28 }
 0x16c   :  { %v795_v36 = vrot.slane %v794_v55, 4  ;;  %v816_v58 = vadd.f32 %v815_v53, %v809_v25 }
 0x16d   :  { %v938_v6 = vrot.slane %v937_v2, 4  ;;  %v959_v30 = vadd.f32 %v958_v3, %v952_v54 }
 0x16e   :  { %v796_v44 = vadd.f32 %v795_v36, %v794_v55  ;;  %v817_v33 = vrot.slane %v816_v58, 4 }
 0x16f   :  { %v939_v21 = vadd.f32 %v938_v6, %v937_v2  ;;  %v960_v18 = vrot.slane %v959_v30, 4 }
 0x170   :  { %v797_v8 = vrot.slane %v796_v44, 2  ;;  %v818_v27 = vadd.f32 %v817_v33, %v816_v58 }
 0x171   :  { %v940_v26 = vrot.slane %v939_v21, 2  ;;  %v961_v24 = vadd.f32 %v960_v18, %v959_v30 }
 0x172   :  { %v798_v52 = vadd.f32 %v797_v8, %v796_v44  ;;  %v819_v47 = vrot.slane %v818_v27, 2 }
 0x173   :  { %v941_v32 = vadd.f32 %v940_v26, %v939_v21  ;;  %v962_v29 = vrot.slane %v961_v24, 2 }
 0x174   :  { %v799_v1 = vrot.slane %v798_v52, 1  ;;  %v820_v13 = vadd.f32 %v819_v47, %v818_v27 }
 0x175   :  { %v942_v7 = vrot.slane %v941_v32, 1  ;;  %v963_v34 = vadd.f32 %v962_v29, %v961_v24 }
 0x176   :  { %v800_v28 = vadd.f32 %v799_v1, %v798_v52  ;;  %v821_v53 = vrot.slane %v820_v13, 1 }
 0x177   :  { %v964_v25 = vrot.slane %v963_v34, 1  ;;  %v943_v6 = vadd.f32 %v942_v7, %v941_v32 }
 0x178   :  { %v801_v36 = vadd.f32 %v800_v28, %v2437_v31  ;;  %v822_v54 = vadd.f32 %v821_v53, %v820_v13 }
 0x179   :  { %v965_v30 = vadd.f32 %v964_v25, %v963_v34 }
 0x17a   :  { %v823_v55 = vadd.f32 %v822_v54, %v2447_v39  ;;  %v2523_v33 = vadd.f32 %v943_v6, %v801_v36  ;;  %v2525_v44 = vpop.f32.mrb[24].mxu0  ;;  %v2527_v26 = vpop.f32.mrb[24].mxu1 }
 0x17b   :  { %3060 = vst [vmem:[#allocation26_spill] sm:$0xff] %v2525_v44  ;;  %3061 = vst [vmem:[#allocation27_spill] sm:$0xff] %v2527_v26  ;;  %v2529_v58 = vpop.f32.mrb[25].mxu0  ;;  %v2531_v2 = vpop.f32.mrb[25].mxu1  ;;  %v1090_v29 = vmul.f32 %v2525_v44, %v2525_v44  ;;  %v1233_v1 = vmul.f32 %v2527_v26, %v2527_v26 }
 0x17c   :  { %3062 = vst [vmem:[#allocation28_spill] sm:$0xff] %v2529_v58  ;;  %3063 = vst [vmem:[#allocation29_spill] sm:$0xff] %v2531_v2  ;;  %v2533_v52 = vadd.f32 %v965_v30, %v823_v55  ;;  %v1231_v31 = vmul.f32 %v2531_v2, %v2531_v2  ;;  %v2537_v24 = vpop.f32.mrb[26].mxu0  ;;  %v2539_v3 = vpop.f32.mrb[26].mxu1  ;;  %v1088_v39 = vmul.f32 %v2529_v58, %v2529_v58 }
 0x17d   :  { %3064 = vst [vmem:[#allocation30_spill] sm:$0xff] %v2537_v24  ;;  %3065 = vst [vmem:[#allocation31_spill] sm:$0xff] %v2539_v3  ;;  %v2543_v21 = vpop.f32.mrb[27].mxu0  ;;  %v2545_v18 = vpop.f32.mrb[27].mxu1  ;;  %v1091_v53 = vmul.f32 %v2537_v24, %v2537_v24 }
 0x17e   :  { %3066 = vst [vmem:[#allocation32_spill] sm:$0xff] %v2543_v21  ;;  %3067 = vst [vmem:[#allocation33_spill] sm:$0xff] %v2545_v18  ;;  %v1074_v8 = vadd.f32 %v2543_v21, %v2529_v58  ;;  %v1089_v27 = vmul.f32 %v2543_v21, %v2543_v21  ;;  %v1217_v47 = vadd.f32 %v2545_v18, %v2531_v2 }
 0x17f   :  { %v1232_v32 = vmul.f32 %v2545_v18, %v2545_v18 }
 0x180   :  { %v1075_v13 = vadd.f32 %v2525_v44, %v1074_v8  ;;  %v1096_v7 = vadd.f32 %v1089_v27, %v1088_v39  ;;  %v1218_v34 = vadd.f32 %v2527_v26, %v1217_v47  ;;  %v1234_v8 = vmul.f32 %v2539_v3, %v2539_v3 }
 0x181   :  { %v1239_v28 = vadd.f32 %v1232_v32, %v1231_v31 }
 0x182   :  { %v1097_v25 = vadd.f32 %v1096_v7, %v1090_v29  ;;  %v2563_v54 = vpop.f32.mrb[28].mxu0  ;;  %v2565_v6 = vpop.f32.mrb[28].mxu1  ;;  %v1076_v55 = vadd.f32 %v2537_v24, %v1075_v13  ;;  %v1219_v30 = vadd.f32 %v2539_v3, %v1218_v34 }
 0x183   :  { %v1240_v36 = vadd.f32 %v1239_v28, %v1233_v1  ;;  %3068 = vst [vmem:[#allocation34_spill] sm:$0xff] %v2563_v54  ;;  %3069 = vst [vmem:[#allocation35_spill] sm:$0xff] %v2565_v6  ;;  %v2571_v39 = vpop.f32.mrb[29].mxu0  ;;  %v2573_v27 = vpop.f32.mrb[29].mxu1 }
 0x184   :  { %3070 = vst [vmem:[#allocation36_spill] sm:$0xff] %v2571_v39  ;;  %3071 = vst [vmem:[#allocation37_spill] sm:$0xff] %v2573_v27  ;;  %v1077_v31 = vadd.f32 %v1076_v55, %v2571_v39  ;;  %v1092_v47 = vmul.f32 %v2571_v39, %v2571_v39  ;;  %v1098_v32 = vadd.f32 %v1097_v25, %v1091_v53  ;;  %v2579_v1 = vpop.f32.mrb[30].mxu0  ;;  %v2581_v13 = vpop.f32.mrb[30].mxu1 }
 0x185   :  { %v1220_v29 = vadd.f32 %v1219_v30, %v2573_v27  ;;  %3072 = vst [vmem:[#allocation38_spill] sm:$0xff] %v2579_v1  ;;  %3073 = vst [vmem:[#allocation39_spill] sm:$0xff] %v2581_v13  ;;  %v1235_v7 = vmul.f32 %v2573_v27, %v2573_v27  ;;  %v1241_v34 = vadd.f32 %v1240_v36, %v1234_v8  ;;  %v2585_v28 = vpop.f32.mrb[31].mxu0  ;;  %v2587_v3 = vpop.f32.mrb[31].mxu1 }
 0x186   :  { %3074 = vst [vmem:[#allocation40_spill] sm:$0xff] %v2585_v28  ;;  %v1099_v26 = vadd.f32 %v1098_v32, %v1092_v47  ;;  %v1078_v55 = vadd.f32 %v1077_v31, %v2585_v28  ;;  %v1093_v53 = vmul.f32 %v2585_v28, %v2585_v28  ;;  %v1236_v18 = vmul.f32 %v2587_v3, %v2587_v3 }
 0x187   :  { %v1221_v25 = vadd.f32 %v1220_v29, %v2587_v3  ;;  %v1242_v30 = vadd.f32 %v1241_v34, %v1235_v7  ;;  %v1094_v27 = vmul.f32 %v2563_v54, %v2563_v54  ;;  %v1237_v31 = vmul.f32 %v2565_v6, %v2565_v6 }
 0x188   :  { %v1079_v36 = vadd.f32 %v2563_v54, %v1078_v55  ;;  %v1100_v8 = vadd.f32 %v1099_v26, %v1093_v53  ;;  %v1095_v32 = vmul.f32 %v2579_v1, %v2579_v1  ;;  %v1238_v28 = vmul.f32 %v2581_v13, %v2581_v13 }
 0x189   :  { %v1222_v2 = vadd.f32 %v2565_v6, %v1221_v25  ;;  %v1243_v47 = vadd.f32 %v1242_v30, %v1236_v18 }
 0x18a   :  { %v1080_v29 = vadd.f32 %v2579_v1, %v1079_v36  ;;  %v1101_v7 = vadd.f32 %v1100_v8, %v1094_v27 }
 0x18b   :  { %v1223_v34 = vadd.f32 %v2581_v13, %v1222_v2  ;;  %v1244_v39 = vadd.f32 %v1243_v47, %v1237_v31 }
 0x18c   :  { %v1081_v55 = vrot.slane %v1080_v29, 4  ;;  %v1102_v26 = vadd.f32 %v1101_v7, %v1095_v32 }
 0x18d   :  { %v1224_v53 = vrot.slane %v1223_v34, 4  ;;  %v1245_v25 = vadd.f32 %v1244_v39, %v1238_v28 }
 0x18e   :  { %v1082_v54 = vadd.f32 %v1081_v55, %v1080_v29  ;;  %v1103_v24 = vrot.slane %v1102_v26, 4 }
 0x18f   :  { %v1225_v6 = vadd.f32 %v1224_v53, %v1223_v34  ;;  %v1246_v18 = vrot.slane %v1245_v25, 4 }
 0x190   :  { %v1083_v30 = vrot.slane %v1082_v54, 2  ;;  %v1104_v44 = vadd.f32 %v1103_v24, %v1102_v26 }
 0x191   :  { %v1226_v21 = vrot.slane %v1225_v6, 2  ;;  %v1247_v58 = vadd.f32 %v1246_v18, %v1245_v25 }
 0x192   :  { %v1084_v36 = vadd.f32 %v1083_v30, %v1082_v54  ;;  %v1105_v27 = vrot.slane %v1104_v44, 2 }
 0x193   :  { %v1227_v8 = vadd.f32 %v1226_v21, %v1225_v6  ;;  %v1248_v2 = vrot.slane %v1247_v58, 2 }
 0x194   :  { %v1085_v1 = vrot.slane %v1084_v36, 1  ;;  %v1106_v60 = vadd.f32 %v1105_v27, %v1104_v44 }
 0x195   :  { %v1228_v13 = vrot.slane %v1227_v8, 1  ;;  %v1249_v31 = vadd.f32 %v1248_v2, %v1247_v58  ;;  %v1266_v58 = vlaneseq }
 0x196   :  { %v1086_v47 = vadd.f32 %v1085_v1, %v1084_v36  ;;  %v1107_v32 = vrot.slane %v1106_v60, 1 }
 0x197   :  { %v1250_v7 = vrot.slane %v1249_v31, 1  ;;  %v1229_v29 = vadd.f32 %v1228_v13, %v1227_v8  ;;  %v1267_v1 = vshrl.u32 %v1266_v58, 7 }
 0x198   :  { %v1087_v39 = vadd.f32 %v1086_v47, %v2523_v33  ;;  %v1108_v28 = vadd.f32 %v1107_v32, %v1106_v60  ;;  %v1258_v33 = vld [vmem:[%s3014_s2] sm:$0x1]  ;;  %s2075_s2 = smov [#allocation8]  }
 0x199   :  { %v1251_v55 = vadd.f32 %v1250_v7, %v1249_v31  ;;  %v1268_v60 = vsub.s32 0, %v1267_v1  ;;  %v3083_v1 = vld [vmem:[#allocation13_spill] sm:$0xff] }
 0x19a   :  { %v1109_v34 = vadd.f32 %v1108_v28, %v2533_v52  ;;  %v1230_v24 = vadd.f32 %v1229_v29, %v1087_v39  ;;  %v1262_v52 = vld [vmem:[%s3015_s3] sm:$0x1]  ;;  %v3075_v29 = vld [vmem:[#allocation17_spill] sm:$0xff]  ;;  %s1609_s3 = sshll.u32 %s2075_s2, 4  ;;  %s1610_s3 = int_to_ptr.vmem [resolvable:$true] %s1609_s3 }
 0x19b   :  { %s2043_s17 = scalar_lea.vmem %s1610_s3, 8192  ;;  %p2048_p3 = scmp.lt.s32.totalorder %s1610_s3, %s1610_s3 }
 0x19c   :  { %v1252_v26 = vadd.f32 %v1251_v55, %v1109_v34  ;;  %v1253_v54 = vmul.f32 0.001953125, %v1230_v24  ;;  %v3076_v34 = vld [vmem:[#allocation12_spill] sm:$0xff]  ;;  %v3077_v24 = vld [vmem:[#allocation15_spill] sm:$0xff]  ;;  %v3078_v55 = vld [vmem:[#allocation21_spill] sm:$0xff]  ;;  %p2044_p2 = scmp.ne.s32.totalorder %s1610_s3, %s2043_s17  ;;  %p2049_p4 = scmp.lt.s32.totalorder %s2043_s17, %s2043_s17 }
 0x19e   :  { %v1254_v53 = vmul.f32 0.001953125, %v1252_v26  ;;  %v1255_v21 = vmul.f32 %v1253_v54, %v1253_v54  ;;  %v3079_v26 = vld [vmem:[#allocation24_spill] sm:$0xff]  ;;  %p2050_p5 = por %p2049_p4, %p2048_p3 }
 0x1a0   :  { %v1256_v6 = vsub.f32 %v1254_v53, %v1255_v21  ;;  %p2051_p6 = pnand %p2050_p5, %p2044_p2 }
 0x1a2   :  { %v1257_v25 = vmax.f32 %v1256_v6, 0.0  ;;  %v3081_v6 = vld [vmem:[#allocation14_spill] sm:$0xff] }
 0x1a4   :  { %v1259_v44 = vadd.f32 1e-05, %v1257_v25 }
 0x1a6   :  { %1997 = vrsqrt.f32 %v1259_v44  ;;  %v3082_v44 = vld [vmem:[#allocation18_spill] sm:$0xff] }
 0x1b0   :  { %v1998_v13 = vpop.eup %1997 }
 0x1b1   :  { %v1261_v18 = vmul.f32 %v1998_v13, %v1258_v33 }
 0x1b3   :  { %v1263_v30 = vmul.f32 %v1261_v18, %v1253_v54  ;;  %v2615_v36 = vrot.slane %v1261_v18, %v1268_v60  ;;  %v3080_v54 = vld [vmem:[#allocation19_spill] sm:$0xff]  ;;  %v3085_v18 = vld [vmem:[#allocation22_spill] sm:$0xff] }
 0x1b5   :  { %v1264_v27 = vsub.f32 %v1262_v52, %v1263_v30  ;;  %v1576_v8 = vmul.f32 %v2615_v36, %v2587_v3  ;;  %v2621_v2 = vmul.f32 %v2615_v36, %v2275_v42  ;;  %v2625_v31 = vmul.f32 %v2615_v36, %v2287_v48  ;;  %v3086_v52 = vld [vmem:[#allocation25_spill] sm:$0xff] }
 0x1b6   :  { %v2629_v47 = vmul.f32 %v2271_v40, %v2615_v36  ;;  %v2633_v32 = vmul.f32 %v2281_v45, %v2615_v36  ;;  %v2637_v7 = vmul.f32 %v2615_v36, %v2315_v4  ;;  %v2641_v42 = vmul.f32 %v2615_v36, %v2331_v15 }
 0x1b7   :  { %v2643_v3 = vrot.slane %v1264_v27, %v1268_v60  ;;  %v2647_v48 = vmul.f32 %v2307_v63, %v2615_v36  ;;  %v2651_v40 = vmul.f32 %v2323_v10, %v2615_v36  ;;  %v2655_v45 = vmul.f32 %v2615_v36, %v2277_v43  ;;  %v3084_v60 = vld [vmem:[#allocation16_spill] sm:$0xff] }
 0x1b8   :  { %v2659_v4 = vmul.f32 %v2615_v36, %v2289_v49  ;;  %v2663_v15 = vmul.f32 %v2273_v41, %v2615_v36  ;;  %v2667_v63 = vmul.f32 %v2283_v46, %v2615_v36  ;;  %v2671_v10 = vmul.f32 %v2615_v36, %v2317_v5  ;;  %v3087_v27 = vld [vmem:[#allocation20_spill] sm:$0xff] }
 0x1b9   :  { %v1584_v39 = vadd.f32 %v1576_v8, %v2643_v3  ;;  %v2676_v43 = vmul.f32 %v2615_v36, %v2333_v16  ;;  %v2680_v49 = vmul.f32 %v2309_v0, %v2615_v36  ;;  %v2684_v41 = vmul.f32 %v2325_v11, %v2615_v36 }
 0x1ba   :  { %v2688_v46 = vmul.f32 %v2615_v36, %v2359_v14  ;;  %v2692_v5 = vmul.f32 %v2615_v36, %v2371_v22  ;;  %v2696_v16 = vmul.f32 %v2353_v9, %v2615_v36  ;;  %v2700_v0 = vmul.f32 %v2365_v19, %v2615_v36 }
 0x1bb   :  { %v1592_v28 = vmax.f32 %v1584_v39, 0.0  ;;  %v2704_v11 = vmul.f32 %v2615_v36, %v2399_v50  ;;  %v2708_v14 = vmul.f32 %v2615_v36, %v2415_v61  ;;  %v2712_v22 = vmul.f32 %v2391_v37, %v2615_v36  ;;  %v3088_v39 = vld [vmem:[#allocation23_spill] sm:$0xff] }
 0x1bc   :  { %v2716_v9 = vmul.f32 %v2407_v56, %v2615_v36  ;;  %v2720_v19 = vmul.f32 %v2615_v36, %v2361_v17  ;;  %v2724_v50 = vmul.f32 %v2615_v36, %v2373_v23  ;;  %v2728_v61 = vmul.f32 %v2355_v12, %v2615_v36 }
 0x1bd   :  { %1601 = vst [vmem:[#allocation8 + $0x1e8] sm:$0xff] %v1592_v28  ;;  %v2732_v37 = vmul.f32 %v2367_v20, %v2615_v36  ;;  %v2736_v56 = vmul.f32 %v2615_v36, %v2401_v51  ;;  %v2740_v17 = vmul.f32 %v2615_v36, %v2417_v62  ;;  %v2744_v23 = vmul.f32 %v2393_v38, %v2615_v36 }
 0x1be   :  { %v2748_v12 = vmul.f32 %v2409_v57, %v2615_v36  ;;  %v2752_v20 = vmul.f32 %v2615_v36, %v2443_v35  ;;  %v2756_v51 = vmul.f32 %v2615_v36, %v3075_v29  ;;  %v2760_v62 = vmul.f32 %v3076_v34, %v2615_v36  ;;  %v3089_v29 = vld [vmem:[#allocation28_spill] sm:$0xff] }
 0x1bf   :  { %v2764_v38 = vmul.f32 %v3077_v24, %v2615_v36  ;;  %v2768_v57 = vmul.f32 %v2615_v36, %v3078_v55  ;;  %v2772_v35 = vmul.f32 %v2615_v36, %v3079_v26  ;;  %v2776_v53 = vmul.f32 %v3080_v54, %v2615_v36  ;;  %v3090_v24 = vld [vmem:[#allocation32_spill] sm:$0xff]  ;;  %v3091_v26 = vld [vmem:[#allocation26_spill] sm:$0xff] }
 0x1c0   :  { %v2780_v21 = vmul.f32 %v2493_v59, %v2615_v36  ;;  %v2784_v25 = vmul.f32 %v2615_v36, %v3081_v6  ;;  %v2788_v58 = vmul.f32 %v2615_v36, %v3082_v44  ;;  %v2792_v33 = vmul.f32 %v3083_v1, %v2615_v36  ;;  %v3092_v6 = vld [vmem:[#allocation30_spill] sm:$0xff]  ;;  %v3094_v1 = vld [vmem:[#allocation36_spill] sm:$0xff] }
 0x1c1   :  { %v2796_v13 = vmul.f32 %v3084_v60, %v2615_v36  ;;  %v2800_v59 = vmul.f32 %v2615_v36, %v3085_v18  ;;  %v2804_v30 = vmul.f32 %v2615_v36, %v3086_v52  ;;  %v2808_v8 = vmul.f32 %v3087_v27, %v2615_v36  ;;  %v3096_v18 = vld [vmem:[#allocation40_spill] sm:$0xff]  ;;  %v3098_v27 = vld [vmem:[#allocation34_spill] sm:$0xff] }
 0x1c2   :  { %v2812_v28 = vmul.f32 %v3088_v39, %v2615_v36  ;;  %v2816_v34 = vmul.f32 %v2615_v36, %v3089_v29  ;;  %v2820_v55 = vmul.f32 %v2615_v36, %v3090_v24  ;;  %v2824_v54 = vmul.f32 %v3091_v26, %v2615_v36  ;;  %v3100_v29 = vld [vmem:[#allocation38_spill] sm:$0xff]  ;;  %v3102_v26 = vld [vmem:[#allocation29_spill] sm:$0xff] }
 0x1c3   :  { %v2828_v44 = vmul.f32 %v3092_v6, %v2615_v36  ;;  %v2832_v60 = vmul.f32 %v2615_v36, %v3094_v1  ;;  %v2836_v52 = vmul.f32 %v2615_v36, %v3096_v18  ;;  %v2840_v39 = vmul.f32 %v3098_v27, %v2615_v36 }
 0x1c4   :  { %v2844_v24 = vmul.f32 %v3100_v29, %v2615_v36  ;;  %v2848_v6 = vmul.f32 %v2615_v36, %v3102_v26 }
 0x1c5   :  { %3093 = vst [vmem:[#allocation17_spill] sm:$0xff] %v2828_v44  ;;  %3095 = vst [vmem:[#allocation12_spill] sm:$0xff] %v2832_v60  ;;  %v3104_v44 = vld [vmem:[#allocation33_spill] sm:$0xff]  ;;  %v3106_v60 = vld [vmem:[#allocation27_spill] sm:$0xff] }
 0x1c6   :  { %3097 = vst [vmem:[#allocation15_spill] sm:$0xff] %v2836_v52  ;;  %3099 = vst [vmem:[#allocation21_spill] sm:$0xff] %v2840_v39  ;;  %v2852_v1 = vmul.f32 %v2615_v36, %v3104_v44  ;;  %v2856_v18 = vmul.f32 %v3106_v60, %v2615_v36  ;;  %v3108_v52 = vld [vmem:[#allocation31_spill] sm:$0xff]  ;;  %v3110_v39 = vld [vmem:[#allocation37_spill] sm:$0xff]  ;;  %v1293_v60 = vadd.f32 %v2621_v2, %v2643_v3 }
 0x1c7   :  { %3101 = vst [vmem:[#allocation24_spill] sm:$0xff] %v2844_v24  ;;  %3103 = vst [vmem:[#allocation19_spill] sm:$0xff] %v2848_v6  ;;  %v2860_v27 = vmul.f32 %v3108_v52, %v2615_v36  ;;  %v2864_v29 = vmul.f32 %v2615_v36, %v3110_v39  ;;  %v3112_v24 = vld [vmem:[#allocation35_spill] sm:$0xff]  ;;  %v1295_v52 = vadd.f32 %v2629_v47, %v2643_v3 }
 0x1c8   :  { %3105 = vst [vmem:[#allocation14_spill] sm:$0xff] %v2852_v1  ;;  %3107 = vst [vmem:[#allocation18_spill] sm:$0xff] %v2856_v18  ;;  %v2868_v26 = vmul.f32 %v3112_v24, %v2615_v36  ;;  %v3114_v6 = vld [vmem:[#allocation39_spill] sm:$0xff]  ;;  %v1294_v18 = vadd.f32 %v2625_v31, %v2643_v3  ;;  %v1296_v39 = vadd.f32 %v2633_v32, %v2643_v3 }
 0x1c9   :  { %3109 = vst [vmem:[#allocation13_spill] sm:$0xff] %v2860_v27  ;;  %3111 = vst [vmem:[#allocation16_spill] sm:$0xff] %v2864_v29  ;;  %v2872_v44 = vmul.f32 %v3114_v6, %v2615_v36  ;;  %v1297_v24 = vadd.f32 %v2637_v7, %v2643_v3  ;;  %v1299_v36 = vadd.f32 %v2647_v48, %v2643_v3  ;;  %v1301_v6 = vmax.f32 %v1293_v60, 0.0 }
 0x1ca   :  { %3113 = vst [vmem:[#allocation22_spill] sm:$0xff] %v2868_v26  ;;  %v1298_v26 = vadd.f32 %v2641_v42, %v2643_v3  ;;  %v1300_v2 = vadd.f32 %v2651_v40, %v2643_v3  ;;  %v1302_v31 = vmax.f32 %v1294_v18, 0.0  ;;  %v1304_v29 = vmax.f32 %v1296_v39, 0.0 }
 0x1cb   :  { %3115 = vst [vmem:[#allocation25_spill] sm:$0xff] %v2872_v44  ;;  %v1303_v44 = vmax.f32 %v1295_v52, 0.0  ;;  %v1305_v47 = vmax.f32 %v1297_v24, 0.0  ;;  %v1307_v1 = vmax.f32 %v1299_v36, 0.0  ;;  %1309 = vst [vmem:[#allocation8] sm:$0xff] %v1301_v6  ;;  %v1333_v7 = vadd.f32 %v2655_v45, %v2643_v3 }
 0x1cc   :  { %v1306_v27 = vmax.f32 %v1298_v26, 0.0  ;;  %v1308_v32 = vmax.f32 %v1300_v2, 0.0  ;;  %1310 = vst [vmem:[#allocation8 + $0x8] sm:$0xff] %v1302_v31  ;;  %1312 = vst [vmem:[#allocation8 + $0x18] sm:$0xff] %v1304_v29  ;;  %v1334_v42 = vadd.f32 %v2659_v4, %v2643_v3  ;;  %v1335_v48 = vadd.f32 %v2663_v15, %v2643_v3 }
 0x1cd   :  { %1311 = vst [vmem:[#allocation8 + $0x10] sm:$0xff] %v1303_v44  ;;  %v1336_v40 = vadd.f32 %v2667_v63, %v2643_v3  ;;  %1313 = vst [vmem:[#allocation8 + $0x20] sm:$0xff] %v1305_v47  ;;  %v1337_v18 = vadd.f32 %v2671_v10, %v2643_v3  ;;  %v1338_v29 = vadd.f32 %v2676_v43, %v2643_v3  ;;  %v1341_v15 = vmax.f32 %v1333_v7, 0.0 }
 0x1ce   :  { %1314 = vst [vmem:[#allocation8 + $0x28] sm:$0xff] %v1306_v27  ;;  %1315 = vst [vmem:[#allocation8 + $0x30] sm:$0xff] %v1307_v1  ;;  %v1339_v45 = vadd.f32 %v2680_v49, %v2643_v3  ;;  %v1340_v4 = vadd.f32 %v2684_v41, %v2643_v3  ;;  %v1342_v26 = vmax.f32 %v1334_v42, 0.0  ;;  %v1343_v44 = vmax.f32 %v1335_v48, 0.0 }
 0x1cf   :  { %1316 = vst [vmem:[#allocation8 + $0x38] sm:$0xff] %v1308_v32  ;;  %v1344_v63 = vmax.f32 %v1336_v40, 0.0  ;;  %v1345_v60 = vmax.f32 %v1337_v18, 0.0  ;;  %v1346_v27 = vmax.f32 %v1338_v29, 0.0  ;;  %1350 = vst [vmem:[#allocation8 + $0x40] sm:$0xff] %v1341_v15  ;;  %v1374_v10 = vadd.f32 %v2688_v46, %v2643_v3 }
 0x1d0   :  { %v1347_v1 = vmax.f32 %v1339_v45, 0.0  ;;  %v1348_v52 = vmax.f32 %v1340_v4, 0.0  ;;  %1351 = vst [vmem:[#allocation8 + $0x48] sm:$0xff] %v1342_v26  ;;  %1352 = vst [vmem:[#allocation8 + $0x50] sm:$0xff] %v1343_v44  ;;  %v1375_v43 = vadd.f32 %v2692_v5, %v2643_v3  ;;  %v1376_v49 = vadd.f32 %v2696_v16, %v2643_v3 }
 0x1d1   :  { %1353 = vst [vmem:[#allocation8 + $0x58] sm:$0xff] %v1344_v63  ;;  %v1377_v41 = vadd.f32 %v2700_v0, %v2643_v3  ;;  %1354 = vst [vmem:[#allocation8 + $0x60] sm:$0xff] %v1345_v60  ;;  %v1378_v39 = vadd.f32 %v2704_v11, %v2643_v3  ;;  %v1379_v24 = vadd.f32 %v2708_v14, %v2643_v3  ;;  %v1382_v16 = vmax.f32 %v1374_v10, 0.0 }
 0x1d2   :  { %1355 = vst [vmem:[#allocation8 + $0x68] sm:$0xff] %v1346_v27  ;;  %1356 = vst [vmem:[#allocation8 + $0x70] sm:$0xff] %v1347_v1  ;;  %v1380_v46 = vadd.f32 %v2712_v22, %v2643_v3  ;;  %v1381_v5 = vadd.f32 %v2716_v9, %v2643_v3  ;;  %v1383_v36 = vmax.f32 %v1375_v43, 0.0  ;;  %v1384_v2 = vmax.f32 %v1376_v49, 0.0 }
 0x1d3   :  { %1357 = vst [vmem:[#allocation8 + $0x78] sm:$0xff] %v1348_v52  ;;  %v1385_v0 = vmax.f32 %v1377_v41, 0.0  ;;  %v1386_v6 = vmax.f32 %v1378_v39, 0.0  ;;  %v1387_v31 = vmax.f32 %v1379_v24, 0.0  ;;  %1391 = vst [vmem:[#allocation8 + $0x80] sm:$0xff] %v1382_v16  ;;  %v1415_v11 = vadd.f32 %v2720_v19, %v2643_v3 }
 0x1d4   :  { %v1388_v47 = vmax.f32 %v1380_v46, 0.0  ;;  %v1389_v32 = vmax.f32 %v1381_v5, 0.0  ;;  %1392 = vst [vmem:[#allocation8 + $0x88] sm:$0xff] %v1383_v36  ;;  %1393 = vst [vmem:[#allocation8 + $0x90] sm:$0xff] %v1384_v2  ;;  %v1416_v14 = vadd.f32 %v2724_v50, %v2643_v3  ;;  %v1417_v22 = vadd.f32 %v2728_v61, %v2643_v3  ;;  %v3117_v36 = vld [vmem:[#allocation12_spill] sm:$0xff] }
 0x1d5   :  { %1394 = vst [vmem:[#allocation8 + $0x98] sm:$0xff] %v1385_v0  ;;  %v1418_v9 = vadd.f32 %v2732_v37, %v2643_v3  ;;  %1395 = vst [vmem:[#allocation8 + $0xa0] sm:$0xff] %v1386_v6  ;;  %v1419_v7 = vadd.f32 %v2736_v56, %v2643_v3  ;;  %v1420_v42 = vadd.f32 %v2740_v17, %v2643_v3  ;;  %v1423_v61 = vmax.f32 %v1415_v11, 0.0  ;;  %v3118_v0 = vld [vmem:[#allocation15_spill] sm:$0xff] }
 0x1d6   :  { %1396 = vst [vmem:[#allocation8 + $0xa8] sm:$0xff] %v1387_v31  ;;  %1397 = vst [vmem:[#allocation8 + $0xb0] sm:$0xff] %v1388_v47  ;;  %v1421_v19 = vadd.f32 %v2744_v23, %v2643_v3  ;;  %v1422_v50 = vadd.f32 %v2748_v12, %v2643_v3  ;;  %v1424_v48 = vmax.f32 %v1416_v14, 0.0  ;;  %v1425_v40 = vmax.f32 %v1417_v22, 0.0 }
 0x1d7   :  { %1398 = vst [vmem:[#allocation8 + $0xb8] sm:$0xff] %v1389_v32  ;;  %v1426_v37 = vmax.f32 %v1418_v9, 0.0  ;;  %v1427_v18 = vmax.f32 %v1419_v7, 0.0  ;;  %v1428_v29 = vmax.f32 %v1420_v42, 0.0  ;;  %1432 = vst [vmem:[#allocation8 + $0xc0] sm:$0xff] %v1423_v61  ;;  %v1456_v56 = vadd.f32 %v2752_v20, %v2643_v3  ;;  %v3122_v61 = vld [vmem:[#allocation14_spill] sm:$0xff] }
 0x1d8   :  { %v1429_v45 = vmax.f32 %v1421_v19, 0.0  ;;  %v1430_v4 = vmax.f32 %v1422_v50, 0.0  ;;  %1433 = vst [vmem:[#allocation8 + $0xc8] sm:$0xff] %v1424_v48  ;;  %1434 = vst [vmem:[#allocation8 + $0xd0] sm:$0xff] %v1425_v40  ;;  %v1457_v17 = vadd.f32 %v2756_v51, %v2643_v3  ;;  %v1458_v23 = vadd.f32 %v2760_v62, %v2643_v3  ;;  %v3121_v19 = vld [vmem:[#allocation19_spill] sm:$0xff]  ;;  %v3123_v40 = vld [vmem:[#allocation18_spill] sm:$0xff] }
 0x1d9   :  { %1435 = vst [vmem:[#allocation8 + $0xd8] sm:$0xff] %v1426_v37  ;;  %v1459_v12 = vadd.f32 %v2764_v38, %v2643_v3  ;;  %1436 = vst [vmem:[#allocation8 + $0xe0] sm:$0xff] %v1427_v18  ;;  %v1460_v15 = vadd.f32 %v2768_v57, %v2643_v3  ;;  %v1461_v26 = vadd.f32 %v2772_v35, %v2643_v3  ;;  %v1464_v62 = vmax.f32 %v1456_v56, 0.0  ;;  %v3124_v18 = vld [vmem:[#allocation13_spill] sm:$0xff]  ;;  %v3126_v56 = vld [vmem:[#allocation22_spill] sm:$0xff] }
 0x1da   :  { %1437 = vst [vmem:[#allocation8 + $0xe8] sm:$0xff] %v1428_v29  ;;  %1438 = vst [vmem:[#allocation8 + $0xf0] sm:$0xff] %v1429_v45  ;;  %v1462_v20 = vadd.f32 %v2776_v53, %v2643_v3  ;;  %v1463_v51 = vadd.f32 %v2780_v21, %v2643_v3  ;;  %v1465_v44 = vmax.f32 %v1457_v17, 0.0  ;;  %v1466_v63 = vmax.f32 %v1458_v23, 0.0  ;;  %v3125_v45 = vld [vmem:[#allocation16_spill] sm:$0xff]  ;;  %v3127_v23 = vld [vmem:[#allocation25_spill] sm:$0xff] }
 0x1db   :  { %1439 = vst [vmem:[#allocation8 + $0xf8] sm:$0xff] %v1430_v4  ;;  %v1467_v38 = vmax.f32 %v1459_v12, 0.0  ;;  %v1468_v60 = vmax.f32 %v1460_v15, 0.0  ;;  %v1469_v27 = vmax.f32 %v1461_v26, 0.0  ;;  %1473 = vst [vmem:[#allocation8 + $0x100] sm:$0xff] %v1464_v62  ;;  %v1497_v57 = vadd.f32 %v2784_v25, %v2643_v3 }
 0x1dc   :  { %v1470_v1 = vmax.f32 %v1462_v20, 0.0  ;;  %v1471_v52 = vmax.f32 %v1463_v51, 0.0  ;;  %1474 = vst [vmem:[#allocation8 + $0x108] sm:$0xff] %v1465_v44  ;;  %1475 = vst [vmem:[#allocation8 + $0x110] sm:$0xff] %v1466_v63  ;;  %v1498_v35 = vadd.f32 %v2788_v58, %v2643_v3  ;;  %v1499_v53 = vadd.f32 %v2792_v33, %v2643_v3 }
 0x1dd   :  { %1476 = vst [vmem:[#allocation8 + $0x118] sm:$0xff] %v1467_v38  ;;  %v1500_v21 = vadd.f32 %v2796_v13, %v2643_v3  ;;  %1477 = vst [vmem:[#allocation8 + $0x120] sm:$0xff] %v1468_v60  ;;  %v1501_v10 = vadd.f32 %v2800_v59, %v2643_v3  ;;  %v1502_v43 = vadd.f32 %v2804_v30, %v2643_v3  ;;  %v1505_v33 = vmax.f32 %v1497_v57, 0.0 }
 0x1de   :  { %1478 = vst [vmem:[#allocation8 + $0x128] sm:$0xff] %v1469_v27  ;;  %1479 = vst [vmem:[#allocation8 + $0x130] sm:$0xff] %v1470_v1  ;;  %v1503_v25 = vadd.f32 %v2808_v8, %v2643_v3  ;;  %v1504_v58 = vadd.f32 %v2812_v28, %v2643_v3  ;;  %v1506_v49 = vmax.f32 %v1498_v35, 0.0  ;;  %v1507_v41 = vmax.f32 %v1499_v53, 0.0  ;;  %v3116_v28 = vld [vmem:[#allocation17_spill] sm:$0xff] }
 0x1df   :  { %1480 = vst [vmem:[#allocation8 + $0x138] sm:$0xff] %v1471_v52  ;;  %v1508_v13 = vmax.f32 %v1500_v21, 0.0  ;;  %v1509_v39 = vmax.f32 %v1501_v10, 0.0  ;;  %v1510_v24 = vmax.f32 %v1502_v43, 0.0  ;;  %1514 = vst [vmem:[#allocation8 + $0x140] sm:$0xff] %v1505_v33  ;;  %v1538_v59 = vadd.f32 %v2816_v34, %v2643_v3  ;;  %v3119_v34 = vld [vmem:[#allocation21_spill] sm:$0xff] }
 0x1e0   :  { %v1511_v46 = vmax.f32 %v1503_v25, 0.0  ;;  %v1512_v5 = vmax.f32 %v1504_v58, 0.0  ;;  %1515 = vst [vmem:[#allocation8 + $0x148] sm:$0xff] %v1506_v49  ;;  %1516 = vst [vmem:[#allocation8 + $0x150] sm:$0xff] %v1507_v41  ;;  %v1539_v30 = vadd.f32 %v2820_v55, %v2643_v3  ;;  %v1540_v8 = vadd.f32 %v2824_v54, %v2643_v3  ;;  %v3120_v55 = vld [vmem:[#allocation24_spill] sm:$0xff] }
 0x1e1   :  { %1517 = vst [vmem:[#allocation8 + $0x158] sm:$0xff] %v1508_v13  ;;  %v1541_v16 = vadd.f32 %v3116_v28, %v2643_v3  ;;  %1518 = vst [vmem:[#allocation8 + $0x160] sm:$0xff] %v1509_v39  ;;  %v1542_v2 = vadd.f32 %v3117_v36, %v2643_v3  ;;  %v1543_v6 = vadd.f32 %v3118_v0, %v2643_v3  ;;  %v1546_v54 = vmax.f32 %v1538_v59, 0.0 }
 0x1e2   :  { %1519 = vst [vmem:[#allocation8 + $0x168] sm:$0xff] %v1510_v24  ;;  %1520 = vst [vmem:[#allocation8 + $0x170] sm:$0xff] %v1511_v46  ;;  %v1544_v31 = vadd.f32 %v3119_v34, %v2643_v3  ;;  %v1545_v47 = vadd.f32 %v3120_v55, %v2643_v3  ;;  %v1547_v32 = vmax.f32 %v1539_v30, 0.0  ;;  %v1548_v11 = vmax.f32 %v1540_v8, 0.0 }
 0x1e3   :  { %1521 = vst [vmem:[#allocation8 + $0x178] sm:$0xff] %v1512_v5  ;;  %v1549_v14 = vmax.f32 %v1541_v16, 0.0  ;;  %v1550_v22 = vmax.f32 %v1542_v2, 0.0  ;;  %v1551_v9 = vmax.f32 %v1543_v6, 0.0  ;;  %1555 = vst [vmem:[#allocation8 + $0x180] sm:$0xff] %v1546_v54  ;;  %v1579_v50 = vadd.f32 %v3121_v19, %v2643_v3 }
 0x1e4   :  { %v1552_v7 = vmax.f32 %v1544_v31, 0.0  ;;  %v1553_v42 = vmax.f32 %v1545_v47, 0.0  ;;  %1556 = vst [vmem:[#allocation8 + $0x188] sm:$0xff] %v1547_v32  ;;  %1557 = vst [vmem:[#allocation8 + $0x190] sm:$0xff] %v1548_v11  ;;  %v1580_v48 = vadd.f32 %v3122_v61, %v2643_v3  ;;  %v1581_v37 = vadd.f32 %v3123_v40, %v2643_v3 }
 0x1e5   :  { %1558 = vst [vmem:[#allocation8 + $0x198] sm:$0xff] %v1549_v14  ;;  %v1582_v29 = vadd.f32 %v3124_v18, %v2643_v3  ;;  %1559 = vst [vmem:[#allocation8 + $0x1a0] sm:$0xff] %v1550_v22  ;;  %v1583_v4 = vadd.f32 %v3125_v45, %v2643_v3  ;;  %v1585_v17 = vadd.f32 %v3126_v56, %v2643_v3  ;;  %v1587_v15 = vmax.f32 %v1579_v50, 0.0 }
 0x1e6   :  { %1560 = vst [vmem:[#allocation8 + $0x1a8] sm:$0xff] %v1551_v9  ;;  %1561 = vst [vmem:[#allocation8 + $0x1b0] sm:$0xff] %v1552_v7  ;;  %v1586_v12 = vadd.f32 %v3127_v23, %v2643_v3  ;;  %v1588_v26 = vmax.f32 %v1580_v48, 0.0  ;;  %v1589_v20 = vmax.f32 %v1581_v37, 0.0 }
 0x1e7   :  { %1562 = vst [vmem:[#allocation8 + $0x1b8] sm:$0xff] %v1553_v42  ;;  %v1590_v51 = vmax.f32 %v1582_v29, 0.0  ;;  %v1591_v62 = vmax.f32 %v1583_v4, 0.0  ;;  %v1593_v44 = vmax.f32 %v1585_v17, 0.0  ;;  %1596 = vst [vmem:[#allocation8 + $0x1c0] sm:$0xff] %v1587_v15 }
 0x1e8   :  { %v1594_v63 = vmax.f32 %v1586_v12, 0.0  ;;  %1597 = vst [vmem:[#allocation8 + $0x1c8] sm:$0xff] %v1588_v26  ;;  %1598 = vst [vmem:[#allocation8 + $0x1d0] sm:$0xff] %v1589_v20 }
 0x1e9   :  { %1599 = vst [vmem:[#allocation8 + $0x1d8] sm:$0xff] %v1590_v51  ;;  %1600 = vst [vmem:[#allocation8 + $0x1e0] sm:$0xff] %v1591_v62 }
 0x1ea   :  { %1602 = vst [vmem:[#allocation8 + $0x1f0] sm:$0xff] %v1593_v44  ;;  %1603 = vst [vmem:[#allocation8 + $0x1f8] sm:$0xff] %v1594_v63 }
 0x1eb   :  { %2054 = shalt.err (!%p2051_p6)
}
 0x1ec   :  { %s2055_s20 = scalar_lea.hbm %s3016_s4, 8192 }
 0x1ed   :  { %p2056_p7 = scmp.ne.s32.totalorder %s3016_s4, %s2055_s20  ;;  %p2059_p8 = scmp.lt.u32.totalorder %s2055_s20, %s3016_s4 }
 0x1ef   :  { %p2061_p9 = pnand %p2059_p8, %p2056_p7 }
 0x1f1   :  { %2064 = shalt.err (!%p2061_p9)
}
 0x1f2   :  { %s2076_s25 = smov 128   ;;  %s2077_s26 = smov 8  }
 0x1f3   :  { %1615 = dma.vmem_to_hbm [thread:$0]  %s1610_s3, 8192, %s3016_s4, [#allocation5], %s2076_s25, %s2076_s25, %s2077_s26  }
 0x1f4   :  { %2069 = dma.done.wait [#allocation5], 8192  }
 0x1f5   :  { %2070 = vsyncadd [#allocation5], 4294959104 }
 0x1f6   :  { %1619 = vsyncpa [#allocation4], 1 }
 0x1f7   :  { %1620 = vsyncpa [#allocation7], 1 }
 0x1f8   :  { %1621 = vsyncpa [#allocation5], 1 }

</bundles_post_ra>
